<compile_context>
chip_gen: v6e
topology: v6e:2x2x1
jax: 0.10.0
libtpu: 0.0.40
codegen_flags: <defaults>
</compile_context>

<pallas_src>
import numpy as np
import jax
import jax.numpy as jnp
from jax.experimental import pallas as pl
from jax.experimental.pallas import tpu as pltpu

PARAM_HIDDEN = 128
LN_EPS = 1e-5


def _sigmoid_k(x):
    # tanh-based sigmoid: exact identity, numerically stable, uses the EUP.
    return 0.5 * (jnp.tanh(0.5 * x) + 1.0)


# ----------------------------- Pallas kernel ---------------------------------

def rnn_gru_kernel(bs_ref,                       # SMEM (T,) int32  batch_sizes
                   x_ref, h0_ref,                # (T,Bp,H), (Bp,H)
                   w_ih_t_ref, w_hh_t_ref,       # (H,3H), (H,3H)
                   b_ih_ref, b_hh_ref,           # (1,3H), (1,3H)
                   w_l_t_ref, b_l_ref,           # (H,H), (1,H)   GLU linear
                   w_g_t_ref, b_g_ref,           # (H,H), (1,H)   GLU gate
                   gamma_ref, beta_ref,          # (1,H), (1,H)   LayerNorm
                   o_ref,                        # (T,Bp,H)
                   h_scr, gx_scr, gru_scr):      # VMEM scratch
    T, b_pad, H = x_ref.shape
    rows = T * b_pad

    # (1) All input-projection gates for every row in ONE big MXU matmul.
    x2d = x_ref[...].reshape(rows, H)
    gx_scr[...] = (
        jnp.dot(x2d, w_ih_t_ref[...], preferred_element_type=jnp.float32)
        + b_ih_ref[...]
    ).reshape(T, b_pad, 3 * H)

    # (2) Sequential GRU recurrence; batched over the b_pad(=8) sublane rows.
    h_scr[...] = h0_ref[...]

    def step(t, carry):
        h = h_scr[...]                                            # (Bp, H)
        gh = jnp.dot(h, w_hh_t_ref[...],
                     preferred_element_type=jnp.float32) + b_hh_ref[...]
        gx = gx_scr[t]                                            # (Bp, 3H)
        r = _sigmoid_k(gx[:, 0:H] + gh[:, 0:H])
        z = _sigmoid_k(gx[:, H:2 * H] + gh[:, H:2 * H])
        n = jnp.tanh(gx[:, 2 * H:3 * H] + r * gh[:, 2 * H:3 * H])
        h_new = (1.0 - z) * n + z * h
        # PackedSequence semantics: only the first batch_sizes[t] (sorted)
        # sequences are active at timestep t; others keep their hidden state.
        active = jax.lax.broadcasted_iota(jnp.int32, (b_pad, H), 0) < bs_ref[t]
        h_upd = jnp.where(active, h_new, h)
        h_scr[...] = h_upd
        gru_scr[t] = h_upd
        return carry

    jax.lax.fori_loop(0, T, step, 0)

    # (3) Fused GLU + skip + LayerNorm over every row at once; single
    #     lane-dense full-block output store.
    g = gru_scr[...].reshape(rows, H)
    skip = x_ref[...].reshape(rows, H)
    lin = jnp.dot(g, w_l_t_ref[...],
                  preferred_element_type=jnp.float32) + b_l_ref[...]
    gate = _sigmoid_k(jnp.dot(g, w_g_t_ref[...],
                              preferred_element_type=jnp.float32) + b_g_ref[...])
    y = lin * gate + skip
    mu = jnp.mean(y, axis=-1, keepdims=True)
    yc = y - mu
    var = jnp.mean(yc * yc, axis=-1, keepdims=True)
    out = yc * jax.lax.rsqrt(var + LN_EPS) * gamma_ref[...] + beta_ref[...]
    o_ref[...] = out.reshape(T, b_pad, H)


def _full_spec(shape):
    nd = len(shape)
    # index_map receives (grid idx, scalar-prefetch ref); always block (0,...).
    return pl.BlockSpec(shape, lambda i, bs, nd=nd: (0,) * nd)


def rnn_gru_pallas(batch_sizes_i32, x_tm, h0_pad, w_ih_t, w_hh_t, b_ih, b_hh,
                   w_l_t, b_l, w_g_t, b_g, gamma, beta):
    T, b_pad, H = x_tm.shape
    H3 = 3 * H
    grid_spec = pltpu.PrefetchScalarGridSpec(
        num_scalar_prefetch=1,            # batch_sizes -> SMEM
        grid=(1,),
        in_specs=[
            _full_spec((T, b_pad, H)),    # x (time-major, sorted, padded)
            _full_spec((b_pad, H)),       # h0 (sorted, padded)
            _full_spec((H, H3)),          # W_ih^T
            _full_spec((H, H3)),          # W_hh^T
            _full_spec((1, H3)),          # b_ih
            _full_spec((1, H3)),          # b_hh
            _full_spec((H, H)),           # W_linear^T
            _full_spec((1, H)),           # b_linear
            _full_spec((H, H)),           # W_gate^T
            _full_spec((1, H)),           # b_gate
            _full_spec((1, H)),           # LN gamma
            _full_spec((1, H)),           # LN beta
        ],
        out_specs=_full_spec((T, b_pad, H)),
        scratch_shapes=[
            pltpu.VMEM((b_pad, H), jnp.float32),       # hidden state
            pltpu.VMEM((T, b_pad, H3), jnp.float32),   # precomputed input gates
            pltpu.VMEM((T, b_pad, H), jnp.float32),    # GRU outputs
        ],
    )
    return pl.pallas_call(
        rnn_gru_kernel,
        out_shape=jax.ShapeDtypeStruct((T, b_pad, H), jnp.float32),
        grid_spec=grid_spec,
        compiler_params=pltpu.CompilerParams(
            dimension_semantics=("arbitrary",)),
    )(batch_sizes_i32, x_tm, h0_pad, w_ih_t, w_hh_t, b_ih, b_hh,
      w_l_t, b_l, w_g_t, b_g, gamma, beta)


# --------------------------- forward (device glue) ----------------------------

def rnn_gru_forward(x_packed, x_meta, params, state_h):
    """Matches RNN_GRU.forward(x, x_meta, state_h): returns (sum_len, H)."""
    batch_sizes, sorted_indices, _unsorted = x_meta["packmeta"]
    bs = np.asarray(batch_sizes, dtype=np.int64)           # metadata (host, tiny)
    T = int(bs.shape[0])
    B = int(bs[0])
    H = int(x_packed.shape[-1])
    total = int(bs.sum())
    b_pad = max(8, ((B + 7) // 8) * 8)

    # Static index arrays from metadata only (vectorized numpy, no activations).
    offsets = np.zeros(T, dtype=np.int64)
    offsets[1:] = np.cumsum(bs)[:-1]
    b_idx = np.arange(b_pad)[None, :]
    src = offsets[:, None] + b_idx
    src = np.where(b_idx < bs[:, None], src, total).astype(np.int32)   # (T, Bp)
    t_of = np.repeat(np.arange(T), bs)
    b_of = np.concatenate([np.arange(int(n)) for n in bs])
    valid = (t_of * b_pad + b_of).astype(np.int32)                     # (total,)

    # Device-side gather: packed (sum_len,H) -> time-major (T, Bp, H).
    x_aug = jnp.concatenate(
        [x_packed.astype(jnp.float32), jnp.zeros((1, H), jnp.float32)], axis=0)
    x_tm = jnp.take(x_aug, jnp.asarray(src.reshape(-1)), axis=0).reshape(
        T, b_pad, H)

    # Initial hidden state permuted to sorted order (as nn.GRU does), padded.
    h0_sorted = jnp.take(state_h.astype(jnp.float32),
                         jnp.asarray(np.asarray(sorted_indices, np.int32)),
                         axis=0)
    h0_pad = jnp.zeros((b_pad, H), jnp.float32).at[:B, :].set(h0_sorted)

    out_tm = rnn_gru_pallas(
        jnp.asarray(bs, jnp.int32), x_tm, h0_pad,
        params["w_ih"].T, params["w_hh"].T,
        params["b_ih"].reshape(1, -1), params["b_hh"].reshape(1, -1),
        params["w_l"].T, params["b_l"].reshape(1, -1),
        params["w_g"].T, params["b_g"].reshape(1, -1),
        params["ln_gamma"].reshape(1, -1), params["ln_beta"].reshape(1, -1))

    # Device-side gather back to packed row order.
    return jnp.take(out_tm.reshape(T * b_pad, H), jnp.asarray(valid), axis=0)


# --------------------- test-input construction & reference --------------------

def pack_padded_sequence_np(padded, lengths):
    """Emulates torch.nn.utils.rnn.pack_padded_sequence (test-input builder)."""
    lengths = np.asarray(lengths)
    sorted_indices = np.argsort(-lengths, kind="stable")
    unsorted_indices = np.argsort(sorted_indices, kind="stable")
    sorted_lengths = lengths[sorted_indices]
    max_len = int(sorted_lengths[0])
    batch_sizes = np.array([(sorted_lengths > t).sum() for t in range(max_len)],
                           dtype=np.int64)
    rows = [padded[sorted_indices[j], t]
            for t in range(max_len) for j in range(int(batch_sizes[t]))]
    data = np.stack(rows, axis=0)
    return data, (batch_sizes, sorted_indices, unsorted_indices)


def _sigmoid_np(x):
    return 0.5 * (np.tanh(0.5 * x) + 1.0)


def ref_rnn_gru_np(x_packed, packmeta, state_h, p):
    """Pure-numpy reference of the same forward math (PyTorch GRU semantics)."""
    batch_sizes, sorted_indices, _ = packmeta
    bs = np.asarray(batch_sizes)
    T = len(bs)
    H = x_packed.shape[1]
    x = np.asarray(x_packed, np.float32)
    offsets = np.zeros(T, np.int64)
    offsets[1:] = np.cumsum(bs)[:-1]
    h = np.asarray(state_h, np.float32)[np.asarray(sorted_indices)].copy()
    gru_out = np.zeros_like(x)
    for t in range(T):
        nb, off = int(bs[t]), int(offsets[t])
        xt, hp = x[off:off + nb], h[:nb]
        gi = xt @ p["w_ih"].T + p["b_ih"]
        gh = hp @ p["w_hh"].T + p["b_hh"]
        r = _sigmoid_np(gi[:, :H] + gh[:, :H])
        z = _sigmoid_np(gi[:, H:2 * H] + gh[:, H:2 * H])
        n = np.tanh(gi[:, 2 * H:] + r * gh[:, 2 * H:])
        hn = (1.0 - z) * n + z * hp
        gru_out[off:off + nb] = hn
        h[:nb] = hn
    lin = gru_out @ p["w_l"].T + p["b_l"]
    gate = _sigmoid_np(gru_out @ p["w_g"].T + p["b_g"])
    y = lin * gate + x
    mu = y.mean(-1, keepdims=True)
    var = ((y - mu) ** 2).mean(-1, keepdims=True)
    return (y - mu) / np.sqrt(var + LN_EPS) * p["ln_gamma"] + p["ln_beta"]


# ----------------------------------- main -------------------------------------

if __name__ == "__main__":
    key = jax.random.PRNGKey(0)
    keys = jax.random.split(key, 10)

    H = PARAM_HIDDEN                      # fixed by the module (param_hidden=128)
    B = 2
    lengths = np.array([12, 16])          # unsorted to exercise sort/unsort path
    T_max = int(lengths.max())

    padded = np.array(jax.random.normal(keys[0], (B, T_max, H), jnp.float32))
    for b in range(B):
        padded[b, lengths[b]:, :] = 0.0
    x_packed_np, packmeta = pack_padded_sequence_np(padded, lengths)
    x_packed = jnp.asarray(x_packed_np)                 # (sum_len=28, 128)
    x_meta = {"packmeta": packmeta}

    state_h = jax.random.normal(keys[1], (B, H), dtype=jnp.float32)

    s = 1.0 / np.sqrt(H)
    params = {
        "w_ih": jax.random.normal(keys[2], (3 * H, H), jnp.float32) * s,
        "w_hh": jax.random.normal(keys[3], (3 * H, H), jnp.float32) * s,
        "b_ih": jax.random.normal(keys[4], (3 * H,), jnp.float32) * s,
        "b_hh": jax.random.normal(keys[5], (3 * H,), jnp.float32) * s,
        "w_l": jax.random.normal(keys[6], (H, H), jnp.float32) * s,
        "b_l": jax.random.normal(keys[7], (H,), jnp.float32) * s,
        "w_g": jax.random.normal(keys[8], (H, H), jnp.float32) * s,
        "b_g": jax.random.normal(keys[9], (H,), jnp.float32) * s,
        "ln_gamma": jnp.ones((H,), jnp.float32),
        "ln_beta": jnp.zeros((H,), jnp.float32),
    }
    # TODO(synk): dropout (p=0 here) is identity in eval; not implemented.

    out = rnn_gru_forward(x_packed, x_meta, params, state_h)
    out = jax.block_until_ready(out)
    assert out.shape == (int(lengths.sum()), H)

    ref = ref_rnn_gru_np(x_packed_np, packmeta, np.asarray(state_h),
                         {k: np.asarray(v) for k, v in params.items()})
    np.testing.assert_allclose(np.asarray(out), ref, rtol=1e-3, atol=1e-3)

    print("KERNEL_OK")
</pallas_src>

<mosaic_0001>
module attributes {stable_mosaic.version = 11 : i64} {
  func.func @rnn_gru_kernel(%arg0: i32, %arg1: memref<16xi32, #tpu.memory_space<smem>>, %arg2: memref<16x8x128xf32, #tpu.memory_space<vmem>>, %arg3: memref<8x128xf32, #tpu.memory_space<vmem>>, %arg4: memref<128x384xf32, #tpu.memory_space<vmem>>, %arg5: memref<128x384xf32, #tpu.memory_space<vmem>>, %arg6: memref<1x384xf32, #tpu.memory_space<vmem>>, %arg7: memref<1x384xf32, #tpu.memory_space<vmem>>, %arg8: memref<128x128xf32, #tpu.memory_space<vmem>>, %arg9: memref<1x128xf32, #tpu.memory_space<vmem>>, %arg10: memref<128x128xf32, #tpu.memory_space<vmem>>, %arg11: memref<1x128xf32, #tpu.memory_space<vmem>>, %arg12: memref<1x128xf32, #tpu.memory_space<vmem>>, %arg13: memref<1x128xf32, #tpu.memory_space<vmem>>, %arg14: memref<16x8x128xf32, #tpu.memory_space<vmem>>, %arg15: memref<8x128xf32, #tpu.memory_space<vmem>>, %arg16: memref<16x8x384xf32, #tpu.memory_space<vmem>>, %arg17: memref<16x8x128xf32, #tpu.memory_space<vmem>>) attributes {dimension_semantics = [#tpu.dimension_semantics<arbitrary>], iteration_bounds = array<i64: 1>, scalar_prefetch = 1 : i64, scratch_operands = 3 : i64, tpu.core_type = #tpu.core_type<tc>, window_params = [{pipeline_mode = #tpu.pipeline_mode<synchronous>, transform_indices = @transform_0, window_bounds = array<i64: 16, 8, 128>}, {pipeline_mode = #tpu.pipeline_mode<synchronous>, transform_indices = @transform_1, window_bounds = array<i64: 8, 128>}, {pipeline_mode = #tpu.pipeline_mode<synchronous>, transform_indices = @transform_2, window_bounds = array<i64: 128, 384>}, {pipeline_mode = #tpu.pipeline_mode<synchronous>, transform_indices = @transform_3, window_bounds = array<i64: 128, 384>}, {pipeline_mode = #tpu.pipeline_mode<synchronous>, transform_indices = @transform_4, window_bounds = array<i64: 1, 384>}, {pipeline_mode = #tpu.pipeline_mode<synchronous>, transform_indices = @transform_5, window_bounds = array<i64: 1, 384>}, {pipeline_mode = #tpu.pipeline_mode<synchronous>, transform_indices = @transform_6, window_bounds = array<i64: 128, 128>}, {pipeline_mode = #tpu.pipeline_mode<synchronous>, transform_indices = @transform_7, window_bounds = array<i64: 1, 128>}, {pipeline_mode = #tpu.pipeline_mode<synchronous>, transform_indices = @transform_8, window_bounds = array<i64: 128, 128>}, {pipeline_mode = #tpu.pipeline_mode<synchronous>, transform_indices = @transform_9, window_bounds = array<i64: 1, 128>}, {pipeline_mode = #tpu.pipeline_mode<synchronous>, transform_indices = @transform_10, window_bounds = array<i64: 1, 128>}, {pipeline_mode = #tpu.pipeline_mode<synchronous>, transform_indices = @transform_11, window_bounds = array<i64: 1, 128>}, {pipeline_mode = #tpu.pipeline_mode<synchronous>, transform_indices = @transform_12, window_bounds = array<i64: 16, 8, 128>}]} {
    %c0 = arith.constant 0 : index
    %c0_0 = arith.constant 0 : index
    %c0_1 = arith.constant 0 : index
    %0 = vector.load %arg2[%c0, %c0_0, %c0_1] : memref<16x8x128xf32, #tpu.memory_space<vmem>>, vector<16x8x128xf32>
    %1 = vector.shape_cast %0 : vector<16x8x128xf32> to vector<128x128xf32>
    %c0_2 = arith.constant 0 : index
    %c0_3 = arith.constant 0 : index
    %2 = vector.load %arg4[%c0_2, %c0_3] : memref<128x384xf32, #tpu.memory_space<vmem>>, vector<128x384xf32>
    %cst = arith.constant dense<0.000000e+00> : vector<128x384xf32>
    %3 = tpu.matmul %1, %2, %cst {dimension_numbers = #tpu.dot_dimension_numbers<[1], [0], [0], [1], [0, 0, 1, 1], [], []>} : vector<128x128xf32>, vector<128x384xf32>, vector<128x384xf32> -> vector<128x384xf32>
    %c0_4 = arith.constant 0 : index
    %c0_5 = arith.constant 0 : index
    %4 = vector.load %arg6[%c0_4, %c0_5] : memref<1x384xf32, #tpu.memory_space<vmem>>, vector<1x384xf32>
    %5 = vector.broadcast %4 : vector<1x384xf32> to vector<128x384xf32>
    %6 = arith.addf %3, %5 : vector<128x384xf32>
    %7 = vector.shape_cast %6 : vector<128x384xf32> to vector<16x8x384xf32>
    %c0_6 = arith.constant 0 : index
    %c0_7 = arith.constant 0 : index
    %c0_8 = arith.constant 0 : index
    %8 = vector.load %arg16[%c0_6, %c0_7, %c0_8] : memref<16x8x384xf32, #tpu.memory_space<vmem>>, vector<16x8x384xf32>
    tpu.vector_store %arg16[%c0_6, %c0_7, %c0_8], %7 {strides = array<i32>} : memref<16x8x384xf32, #tpu.memory_space<vmem>>, vector<16x8x384xf32>,
    %c0_9 = arith.constant 0 : index
    %c0_10 = arith.constant 0 : index
    %9 = vector.load %arg3[%c0_9, %c0_10] : memref<8x128xf32, #tpu.memory_space<vmem>>, vector<8x128xf32>
    %c0_11 = arith.constant 0 : index
    %c0_12 = arith.constant 0 : index
    %10 = vector.load %arg15[%c0_11, %c0_12] : memref<8x128xf32, #tpu.memory_space<vmem>>, vector<8x128xf32>
    tpu.vector_store %arg15[%c0_11, %c0_12], %9 {strides = array<i32>} : memref<8x128xf32, #tpu.memory_space<vmem>>, vector<8x128xf32>,
    %c0_i32 = arith.constant 0 : i32
    %c16_i32 = arith.constant 16 : i32
    %11 = arith.addi %c0_i32, %c16_i32 : i32
    %c1_i32 = arith.constant 1 : i32
    scf.for %arg18 = %c0_i32 to %11 step %c1_i32  : i32 {
      %c0_45 = arith.constant 0 : index
      %c0_46 = arith.constant 0 : index
      %59 = vector.load %arg15[%c0_45, %c0_46] : memref<8x128xf32, #tpu.memory_space<vmem>>, vector<8x128xf32>
      %c0_47 = arith.constant 0 : index
      %c0_48 = arith.constant 0 : index
      %60 = vector.load %arg5[%c0_47, %c0_48] : memref<128x384xf32, #tpu.memory_space<vmem>>, vector<128x384xf32>
      %cst_49 = arith.constant dense<0.000000e+00> : vector<8x384xf32>
      %61 = tpu.matmul %59, %60, %cst_49 {dimension_numbers = #tpu.dot_dimension_numbers<[1], [0], [0], [1], [0, 0, 1, 1], [], []>} : vector<8x128xf32>, vector<128x384xf32>, vector<8x384xf32> -> vector<8x384xf32>
      %c0_50 = arith.constant 0 : index
      %c0_51 = arith.constant 0 : index
      %62 = vector.load %arg7[%c0_50, %c0_51] : memref<1x384xf32, #tpu.memory_space<vmem>>, vector<1x384xf32>
      %63 = vector.broadcast %62 : vector<1x384xf32> to vector<8x384xf32>
      %64 = arith.addf %61, %63 : vector<8x384xf32>
      %65 = arith.index_cast %arg18 : i32 to index
      %c0_52 = arith.constant 0 : index
      %c0_53 = arith.constant 0 : index
      %66 = vector.load %arg16[%65, %c0_52, %c0_53] : memref<16x8x384xf32, #tpu.memory_space<vmem>>, vector<1x8x384xf32>
      %67 = vector.shape_cast %66 : vector<1x8x384xf32> to vector<8x384xf32>
      %68 = vector.extract_strided_slice %67 {offsets = [0, 0], sizes = [8, 128], strides = [1, 1]} : vector<8x384xf32> to vector<8x128xf32>
      %69 = vector.extract_strided_slice %64 {offsets = [0, 0], sizes = [8, 128], strides = [1, 1]} : vector<8x384xf32> to vector<8x128xf32>
      %70 = arith.addf %68, %69 : vector<8x128xf32>
      %cst_54 = arith.constant 5.000000e-01 : f32
      %71 = vector.broadcast %cst_54 : f32 to vector<8x128xf32>
      %72 = arith.mulf %71, %70 : vector<8x128xf32>
      %73 = math.tanh %72 : vector<8x128xf32>
      %cst_55 = arith.constant 1.000000e+00 : f32
      %74 = vector.broadcast %cst_55 : f32 to vector<8x128xf32>
      %75 = arith.addf %73, %74 : vector<8x128xf32>
      %cst_56 = arith.constant 5.000000e-01 : f32
      %76 = vector.broadcast %cst_56 : f32 to vector<8x128xf32>
      %77 = arith.mulf %76, %75 : vector<8x128xf32>
      %78 = vector.extract_strided_slice %67 {offsets = [0, 128], sizes = [8, 128], strides = [1, 1]} : vector<8x384xf32> to vector<8x128xf32>
      %79 = vector.extract_strided_slice %64 {offsets = [0, 128], sizes = [8, 128], strides = [1, 1]} : vector<8x384xf32> to vector<8x128xf32>
      %80 = arith.addf %78, %79 : vector<8x128xf32>
      %cst_57 = arith.constant 5.000000e-01 : f32
      %81 = vector.broadcast %cst_57 : f32 to vector<8x128xf32>
      %82 = arith.mulf %81, %80 : vector<8x128xf32>
      %83 = math.tanh %82 : vector<8x128xf32>
      %cst_58 = arith.constant 1.000000e+00 : f32
      %84 = vector.broadcast %cst_58 : f32 to vector<8x128xf32>
      %85 = arith.addf %83, %84 : vector<8x128xf32>
      %cst_59 = arith.constant 5.000000e-01 : f32
      %86 = vector.broadcast %cst_59 : f32 to vector<8x128xf32>
      %87 = arith.mulf %86, %85 : vector<8x128xf32>
      %88 = vector.extract_strided_slice %67 {offsets = [0, 256], sizes = [8, 128], strides = [1, 1]} : vector<8x384xf32> to vector<8x128xf32>
      %89 = vector.extract_strided_slice %64 {offsets = [0, 256], sizes = [8, 128], strides = [1, 1]} : vector<8x384xf32> to vector<8x128xf32>
      %90 = arith.mulf %77, %89 : vector<8x128xf32>
      %91 = arith.addf %88, %90 : vector<8x128xf32>
      %92 = math.tanh %91 : vector<8x128xf32>
      %cst_60 = arith.constant 1.000000e+00 : f32
      %93 = vector.broadcast %cst_60 : f32 to vector<8x128xf32>
      %94 = arith.subf %93, %87 : vector<8x128xf32>
      %95 = arith.mulf %94, %92 : vector<8x128xf32>
      %96 = arith.mulf %87, %59 : vector<8x128xf32>
      %97 = arith.addf %95, %96 : vector<8x128xf32>
      %98 = tpu.iota {dimensions = array<i32: 0>} : vector<8x128xi32>
      %99 = arith.index_cast %arg18 : i32 to index
      %100 = memref.load %arg1[%99] : memref<16xi32, #tpu.memory_space<smem>>
      %101 = vector.broadcast %100 : i32 to vector<8x128xi32>
      %102 = arith.cmpi slt, %98, %101 : vector<8x128xi32>
      %103 = arith.select %102, %97, %59 : vector<8x128xi1>, vector<8x128xf32>
      %c0_61 = arith.constant 0 : index
      %c0_62 = arith.constant 0 : index
      %104 = vector.load %arg15[%c0_61, %c0_62] : memref<8x128xf32, #tpu.memory_space<vmem>>, vector<8x128xf32>
      tpu.vector_store %arg15[%c0_61, %c0_62], %103 {strides = array<i32>} : memref<8x128xf32, #tpu.memory_space<vmem>>, vector<8x128xf32>,
      %105 = arith.index_cast %arg18 : i32 to index
      %c0_63 = arith.constant 0 : index
      %c0_64 = arith.constant 0 : index
      %106 = vector.load %arg17[%105, %c0_63, %c0_64] : memref<16x8x128xf32, #tpu.memory_space<vmem>>, vector<1x8x128xf32>
      %107 = vector.shape_cast %106 : vector<1x8x128xf32> to vector<8x128xf32>
      %108 = vector.shape_cast %103 : vector<8x128xf32> to vector<1x8x128xf32>
      tpu.vector_store %arg17[%105, %c0_63, %c0_64], %108 {strides = array<i32>} : memref<16x8x128xf32, #tpu.memory_space<vmem>>, vector<1x8x128xf32>,
    }
    %c16_i32_13 = arith.constant 16 : i32
    %c0_14 = arith.constant 0 : index
    %c0_15 = arith.constant 0 : index
    %c0_16 = arith.constant 0 : index
    %12 = vector.load %arg17[%c0_14, %c0_15, %c0_16] : memref<16x8x128xf32, #tpu.memory_space<vmem>>, vector<16x8x128xf32>
    %13 = vector.shape_cast %12 : vector<16x8x128xf32> to vector<128x128xf32>
    %c0_17 = arith.constant 0 : index
    %c0_18 = arith.constant 0 : index
    %c0_19 = arith.constant 0 : index
    %14 = vector.load %arg2[%c0_17, %c0_18, %c0_19] : memref<16x8x128xf32, #tpu.memory_space<vmem>>, vector<16x8x128xf32>
    %15 = vector.shape_cast %14 : vector<16x8x128xf32> to vector<128x128xf32>
    %c0_20 = arith.constant 0 : index
    %c0_21 = arith.constant 0 : index
    %16 = vector.load %arg8[%c0_20, %c0_21] : memref<128x128xf32, #tpu.memory_space<vmem>>, vector<128x128xf32>
    %cst_22 = arith.constant dense<0.000000e+00> : vector<128x128xf32>
    %17 = tpu.matmul %13, %16, %cst_22 {dimension_numbers = #tpu.dot_dimension_numbers<[1], [0], [0], [1], [0, 0, 1, 1], [], []>} : vector<128x128xf32>, vector<128x128xf32>, vector<128x128xf32> -> vector<128x128xf32>
    %c0_23 = arith.constant 0 : index
    %c0_24 = arith.constant 0 : index
    %18 = vector.load %arg9[%c0_23, %c0_24] : memref<1x128xf32, #tpu.memory_space<vmem>>, vector<1x128xf32>
    %19 = vector.broadcast %18 : vector<1x128xf32> to vector<128x128xf32>
    %20 = arith.addf %17, %19 : vector<128x128xf32>
    %c0_25 = arith.constant 0 : index
    %c0_26 = arith.constant 0 : index
    %21 = vector.load %arg10[%c0_25, %c0_26] : memref<128x128xf32, #tpu.memory_space<vmem>>, vector<128x128xf32>
    %cst_27 = arith.constant dense<0.000000e+00> : vector<128x128xf32>
    %22 = tpu.matmul %13, %21, %cst_27 {dimension_numbers = #tpu.dot_dimension_numbers<[1], [0], [0], [1], [0, 0, 1, 1], [], []>} : vector<128x128xf32>, vector<128x128xf32>, vector<128x128xf32> -> vector<128x128xf32>
    %c0_28 = arith.constant 0 : index
    %c0_29 = arith.constant 0 : index
    %23 = vector.load %arg11[%c0_28, %c0_29] : memref<1x128xf32, #tpu.memory_space<vmem>>, vector<1x128xf32>
    %24 = vector.broadcast %23 : vector<1x128xf32> to vector<128x128xf32>
    %25 = arith.addf %22, %24 : vector<128x128xf32>
    %cst_30 = arith.constant 5.000000e-01 : f32
    %26 = vector.broadcast %cst_30 : f32 to vector<128x128xf32>
    %27 = arith.mulf %26, %25 : vector<128x128xf32>
    %28 = math.tanh %27 : vector<128x128xf32>
    %cst_31 = arith.constant 1.000000e+00 : f32
    %29 = vector.broadcast %cst_31 : f32 to vector<128x128xf32>
    %30 = arith.addf %28, %29 : vector<128x128xf32>
    %cst_32 = arith.constant 5.000000e-01 : f32
    %31 = vector.broadcast %cst_32 : f32 to vector<128x128xf32>
    %32 = arith.mulf %31, %30 : vector<128x128xf32>
    %33 = arith.mulf %20, %32 : vector<128x128xf32>
    %34 = arith.addf %33, %15 : vector<128x128xf32>
    %cst_33 = arith.constant dense<0.000000e+00> : vector<128xf32>
    %35 = vector.multi_reduction <add>, %34, %cst_33 [1] : vector<128x128xf32> to vector<128xf32>
    %36 = vector.shape_cast %35 : vector<128xf32> to vector<128x1xf32>
    %cst_34 = arith.constant 1.280000e+02 : f32
    %37 = vector.broadcast %cst_34 : f32 to vector<128x1xf32>
    %38 = arith.divf %36, %37 : vector<128x1xf32>
    %39 = vector.broadcast %38 : vector<128x1xf32> to vector<128x128xf32>
    %40 = arith.subf %34, %39 : vector<128x128xf32>
    %41 = arith.mulf %40, %40 : vector<128x128xf32>
    %cst_35 = arith.constant dense<0.000000e+00> : vector<128xf32>
    %42 = vector.multi_reduction <add>, %41, %cst_35 [1] : vector<128x128xf32> to vector<128xf32>
    %43 = vector.shape_cast %42 : vector<128xf32> to vector<128x1xf32>
    %cst_36 = arith.constant 1.280000e+02 : f32
    %44 = vector.broadcast %cst_36 : f32 to vector<128x1xf32>
    %45 = arith.divf %43, %44 : vector<128x1xf32>
    %cst_37 = arith.constant 9.99999974E-6 : f32
    %46 = vector.broadcast %cst_37 : f32 to vector<128x1xf32>
    %47 = arith.addf %45, %46 : vector<128x1xf32>
    %48 = math.rsqrt %47 : vector<128x1xf32>
    %49 = vector.broadcast %48 : vector<128x1xf32> to vector<128x128xf32>
    %50 = arith.mulf %40, %49 : vector<128x128xf32>
    %c0_38 = arith.constant 0 : index
    %c0_39 = arith.constant 0 : index
    %51 = vector.load %arg12[%c0_38, %c0_39] : memref<1x128xf32, #tpu.memory_space<vmem>>, vector<1x128xf32>
    %52 = vector.broadcast %51 : vector<1x128xf32> to vector<128x128xf32>
    %53 = arith.mulf %50, %52 : vector<128x128xf32>
    %c0_40 = arith.constant 0 : index
    %c0_41 = arith.constant 0 : index
    %54 = vector.load %arg13[%c0_40, %c0_41] : memref<1x128xf32, #tpu.memory_space<vmem>>, vector<1x128xf32>
    %55 = vector.broadcast %54 : vector<1x128xf32> to vector<128x128xf32>
    %56 = arith.addf %53, %55 : vector<128x128xf32>
    %57 = vector.shape_cast %56 : vector<128x128xf32> to vector<16x8x128xf32>
    %c0_42 = arith.constant 0 : index
    %c0_43 = arith.constant 0 : index
    %c0_44 = arith.constant 0 : index
    %58 = vector.load %arg14[%c0_42, %c0_43, %c0_44] : memref<16x8x128xf32, #tpu.memory_space<vmem>>, vector<16x8x128xf32>
    tpu.vector_store %arg14[%c0_42, %c0_43, %c0_44], %57 {strides = array<i32>} : memref<16x8x128xf32, #tpu.memory_space<vmem>>, vector<16x8x128xf32>,
    return
  }
  func.func @transform_0(%arg0: i32, %arg1: memref<16xi32, #tpu.memory_space<smem>>) -> (i32, i32, i32) {
    %c0_i32 = arith.constant 0 : i32
    %c0_i32_0 = arith.constant 0 : i32
    %c0_i32_1 = arith.constant 0 : i32
    %c0_i32_2 = arith.constant 0 : i32
    return %c0_i32, %c0_i32_0, %c0_i32_1 : i32, i32, i32
  }
  func.func @transform_1(%arg0: i32, %arg1: memref<16xi32, #tpu.memory_space<smem>>) -> (i32, i32) {
    %c0_i32 = arith.constant 0 : i32
    %c0_i32_0 = arith.constant 0 : i32
    %c0_i32_1 = arith.constant 0 : i32
    return %c0_i32, %c0_i32_0 : i32, i32
  }
  func.func @transform_2(%arg0: i32, %arg1: memref<16xi32, #tpu.memory_space<smem>>) -> (i32, i32) {
    %c0_i32 = arith.constant 0 : i32
    %c0_i32_0 = arith.constant 0 : i32
    %c0_i32_1 = arith.constant 0 : i32
    return %c0_i32, %c0_i32_0 : i32, i32
  }
  func.func @transform_3(%arg0: i32, %arg1: memref<16xi32, #tpu.memory_space<smem>>) -> (i32, i32) {
    %c0_i32 = arith.constant 0 : i32
    %c0_i32_0 = arith.constant 0 : i32
    %c0_i32_1 = arith.constant 0 : i32
    return %c0_i32, %c0_i32_0 : i32, i32
  }
  func.func @transform_4(%arg0: i32, %arg1: memref<16xi32, #tpu.memory_space<smem>>) -> (i32, i32) {
    %c0_i32 = arith.constant 0 : i32
    %c0_i32_0 = arith.constant 0 : i32
    %c0_i32_1 = arith.constant 0 : i32
    return %c0_i32, %c0_i32_0 : i32, i32
  }
  func.func @transform_5(%arg0: i32, %arg1: memref<16xi32, #tpu.memory_space<smem>>) -> (i32, i32) {
    %c0_i32 = arith.constant 0 : i32
    %c0_i32_0 = arith.constant 0 : i32
    %c0_i32_1 = arith.constant 0 : i32
    return %c0_i32, %c0_i32_0 : i32, i32
  }
  func.func @transform_6(%arg0: i32, %arg1: memref<16xi32, #tpu.memory_space<smem>>) -> (i32, i32) {
    %c0_i32 = arith.constant 0 : i32
    %c0_i32_0 = arith.constant 0 : i32
    %c0_i32_1 = arith.constant 0 : i32
    return %c0_i32, %c0_i32_0 : i32, i32
  }
  func.func @transform_7(%arg0: i32, %arg1: memref<16xi32, #tpu.memory_space<smem>>) -> (i32, i32) {
    %c0_i32 = arith.constant 0 : i32
    %c0_i32_0 = arith.constant 0 : i32
    %c0_i32_1 = arith.constant 0 : i32
    return %c0_i32, %c0_i32_0 : i32, i32
  }
  func.func @transform_8(%arg0: i32, %arg1: memref<16xi32, #tpu.memory_space<smem>>) -> (i32, i32) {
    %c0_i32 = arith.constant 0 : i32
    %c0_i32_0 = arith.constant 0 : i32
    %c0_i32_1 = arith.constant 0 : i32
    return %c0_i32, %c0_i32_0 : i32, i32
  }
  func.func @transform_9(%arg0: i32, %arg1: memref<16xi32, #tpu.memory_space<smem>>) -> (i32, i32) {
    %c0_i32 = arith.constant 0 : i32
    %c0_i32_0 = arith.constant 0 : i32
    %c0_i32_1 = arith.constant 0 : i32
    return %c0_i32, %c0_i32_0 : i32, i32
  }
  func.func @transform_10(%arg0: i32, %arg1: memref<16xi32, #tpu.memory_space<smem>>) -> (i32, i32) {
    %c0_i32 = arith.constant 0 : i32
    %c0_i32_0 = arith.constant 0 : i32
    %c0_i32_1 = arith.constant 0 : i32
    return %c0_i32, %c0_i32_0 : i32, i32
  }
  func.func @transform_11(%arg0: i32, %arg1: memref<16xi32, #tpu.memory_space<smem>>) -> (i32, i32) {
    %c0_i32 = arith.constant 0 : i32
    %c0_i32_0 = arith.constant 0 : i32
    %c0_i32_1 = arith.constant 0 : i32
    return %c0_i32, %c0_i32_0 : i32, i32
  }
  func.func @transform_12(%arg0: i32, %arg1: memref<16xi32, #tpu.memory_space<smem>>) -> (i32, i32, i32) {
    %c0_i32 = arith.constant 0 : i32
    %c0_i32_0 = arith.constant 0 : i32
    %c0_i32_1 = arith.constant 0 : i32
    %c0_i32_2 = arith.constant 0 : i32
    return %c0_i32, %c0_i32_0, %c0_i32_1 : i32, i32, i32
  }
}

</mosaic_0001>

<bundles_post_ra>
// kernel: tpu_custom_call.1
= control target key start
LH: loop header
LB: loop body
LE: loop exit
PB: predicated region body
PF: predicated region fallthrough
CT: control target
= control target key end

     0   :  { %s2126_s25 = smov [#allocation6]   ;;  %s2619_s0 = inlined_call_operand.hbm [shape: s32[16], index: 0, kind: input, shape index: {}]   ;;  %s2620_s1 = inlined_call_operand.hbm [shape: f32[16,8,128], index: 1, kind: input, shape index: {}]   ;;  %s2621_s2 = inlined_call_operand.hbm [shape: f32[8,128], index: 2, kind: input, shape index: {}]   ;;  %s2622_s3 = inlined_call_operand.hbm [shape: f32[128,384], index: 3, kind: input, shape index: {}]   ;;  %s2623_s4 = inlined_call_operand.hbm [shape: f32[128,384], index: 4, kind: input, shape index: {}]   ;;  %s2624_s5 = inlined_call_operand.vmem [shape: f32[1,384], index: 5, kind: input, shape index: {}]   ;;  %s2625_s6 = inlined_call_operand.vmem [shape: f32[1,384], index: 6, kind: input, shape index: {}]   ;;  %s2626_s7 = inlined_call_operand.hbm [shape: f32[128,128], index: 7, kind: input, shape index: {}]   ;;  %s2627_s8 = inlined_call_operand.vmem [shape: f32[1,128], index: 8, kind: input, shape index: {}]   ;;  %s2628_s9 = inlined_call_operand.hbm [shape: f32[128,128], index: 9, kind: input, shape index: {}]   ;;  %s2629_s10 = inlined_call_operand.vmem [shape: f32[1,128], index: 10, kind: input, shape index: {}]   ;;  %s2630_s11 = inlined_call_operand.vmem [shape: f32[1,128], index: 11, kind: input, shape index: {}]   ;;  %s2631_s12 = inlined_call_operand.vmem [shape: f32[1,128], index: 12, kind: input, shape index: {}]   ;;  %s2632_s13 = inlined_call_operand.hbm [shape: f32[16,8,128], index: 13, kind: output, shape index: {}]  }
   0x1   :  { %19 = dma.hbm_to_smem %s2619_s0, 16, %s2126_s25, [#allocation5] }
   0x2   :  { %2110 = dma.done.wait [#allocation5], 16 }
   0x3   :  { %2111 = vsyncadd [#allocation5], 4294967280 }
   0x4   :  { %21 = sfence }
   0x5   :  { %22 = vsyncpa [#allocation8], 0 }
   0x6   :  { %23 = vsyncpa [#allocation11], 0 }
   0x7   :  { %24 = vsyncpa [#allocation14], 0 }
   0x8   :  { %25 = vsyncpa [#allocation17], 0 }
   0x9   :  { %26 = vsyncpa [#allocation9], 0  ;;  %s2127_s28 = smov [#allocation10]  }
   0xa   :  { %s45_s29 = sshll.u32 %s2127_s28, 4  ;;  %s46_s29 = int_to_ptr.vmem [resolvable:$true] %s45_s29 }
   0xb   :  { %s1974_s30 = scalar_lea.vmem %s46_s29, 128  ;;  %p1979_p1 = scmp.lt.s32.totalorder %s46_s29, %s46_s29 }
   0xc   :  { %p1975_p0 = scmp.ne.s32.totalorder %s46_s29, %s1974_s30  ;;  %p1980_p2 = scmp.lt.s32.totalorder %s1974_s30, %s1974_s30 }
   0xe   :  { %p1981_p3 = por %p1980_p2, %p1979_p1 }
  0x10   :  { %p1982_p4 = pnand %p1981_p3, %p1975_p0 }
  0x12   :  { %1985 = shalt.err (!%p1982_p4)
}
  0x13   :  { %48 = dma.hbm_to_vmem [thread:$0]  %s2621_s2, 128, %s46_s29, [#allocation11]  }
  0x14   :  { %s2128_s15 = smov [#allocation13]   ;;  %s2129_s17 = smov [#allocation7]  }
  0x15   :  { %s66_s16 = sshll.u32 %s2128_s15, 4  ;;  %s32_s18 = sshll.u32 %s2129_s17, 4  ;;  %s67_s16 = int_to_ptr.vmem [resolvable:$true] %s66_s16  ;;  %s33_s18 = int_to_ptr.vmem [resolvable:$true] %s32_s18 }
  0x16   :  { %s1994_s19 = scalar_lea.vmem %s67_s16, 6144  ;;  %p1999_p6 = scmp.lt.s32.totalorder %s67_s16, %s67_s16 }
  0x17   :  { %p1995_p5 = scmp.ne.s32.totalorder %s67_s16, %s1994_s19  ;;  %p2000_p7 = scmp.lt.s32.totalorder %s1994_s19, %s1994_s19 }
  0x19   :  { %p2001_p8 = por %p2000_p7, %p1999_p6 }
  0x1b   :  { %p2002_p9 = pnand %p2001_p8, %p1995_p5 }
  0x1d   :  { %2005 = shalt.err (!%p2002_p9)
}
  0x1e   :  { %s2130_s20 = smov 384   ;;  %s2131_s21 = smov 24  }
  0x1f   :  { %72 = dma.hbm_to_vmem [thread:$0]  %s2623_s4, 6144, %s67_s16, [#allocation14], %s2130_s20, %s2130_s20, %s2131_s21  }
  0x20   :  { %s2014_s2 = scalar_lea.vmem %s33_s18, 2048  ;;  %p2019_p11 = scmp.lt.s32.totalorder %s33_s18, %s33_s18 }
  0x21   :  { %p2015_p10 = scmp.ne.s32.totalorder %s33_s18, %s2014_s2  ;;  %p2020_p12 = scmp.lt.s32.totalorder %s2014_s2, %s2014_s2 }
  0x23   :  { %p2021_p13 = por %p2020_p12, %p2019_p11 }
  0x25   :  { %p2022_p0 = pnand %p2021_p13, %p2015_p10 }
  0x27   :  { %2025 = shalt.err (!%p2022_p0)
}
  0x28   :  { %s2132_s24 = smov 128   ;;  %s2133_s25 = smov 8  }
  0x29   :  { %38 = dma.hbm_to_vmem [thread:$0]  %s2620_s1, 2048, %s33_s18, [#allocation8], %s2132_s24, %s2132_s24, %s2133_s25  }
  0x2a   :  { %s2134_s28 = smov [#allocation12]   ;;  %s2135_s4 = smov [#allocation15]  }
  0x2b   :  { %s54_s29 = sshll.u32 %s2134_s28, 4  ;;  %s82_s30 = sshll.u32 %s2135_s4, 4  ;;  %s55_s29 = int_to_ptr.vmem [resolvable:$true] %s54_s29  ;;  %s83_s30 = int_to_ptr.vmem [resolvable:$true] %s82_s30 }
  0x2c   :  { %s2034_s14 = scalar_lea.vmem %s55_s29, 6144  ;;  %p2039_p2 = scmp.lt.s32.totalorder %s55_s29, %s55_s29 }
  0x2d   :  { %p2035_p1 = scmp.ne.s32.totalorder %s55_s29, %s2034_s14  ;;  %p2040_p3 = scmp.lt.s32.totalorder %s2034_s14, %s2034_s14 }
  0x2f   :  { %p2041_p4 = por %p2040_p3, %p2039_p2 }
  0x31   :  { %p2042_p5 = pnand %p2041_p4, %p2035_p1 }
  0x33   :  { %2045 = shalt.err (!%p2042_p5)
}
  0x34   :  { %60 = dma.hbm_to_vmem [thread:$0]  %s2622_s3, 6144, %s55_s29, [#allocation11], %s2130_s20, %s2130_s20, %s2131_s21  }
  0x35   :  { %s2054_s16 = scalar_lea.vmem %s83_s30, 2048  ;;  %p2059_p7 = scmp.lt.s32.totalorder %s83_s30, %s83_s30 }
  0x36   :  { %p2055_p6 = scmp.ne.s32.totalorder %s83_s30, %s2054_s16  ;;  %p2060_p8 = scmp.lt.s32.totalorder %s2054_s16, %s2054_s16 }
  0x38   :  { %p2061_p9 = por %p2060_p8, %p2059_p7 }
  0x3a   :  { %p2062_p10 = pnand %p2061_p9, %p2055_p6 }
  0x3c   :  { %2065 = shalt.err (!%p2062_p10)
}
  0x3d   :  { %88 = dma.hbm_to_vmem [thread:$0]  %s2626_s7, 2048, %s83_s30, [#allocation14], %s2132_s24, %s2132_s24, %s2133_s25  }
  0x3e   :  { %s2136_s18 = smov [#allocation16]  }
  0x3f   :  { %s96_s19 = sshll.u32 %s2136_s18, 4  ;;  %s97_s19 = int_to_ptr.vmem [resolvable:$true] %s96_s19 }
  0x40   :  { %s2074_s22 = scalar_lea.vmem %s97_s19, 2048  ;;  %p2079_p12 = scmp.lt.s32.totalorder %s97_s19, %s97_s19 }
  0x41   :  { %p2075_p11 = scmp.ne.s32.totalorder %s97_s19, %s2074_s22  ;;  %p2080_p13 = scmp.lt.s32.totalorder %s2074_s22, %s2074_s22 }
  0x43   :  { %p2081_p0 = por %p2080_p13, %p2079_p12 }
  0x45   :  { %p2082_p1 = pnand %p2081_p0, %p2075_p11 }
  0x47   :  { %2085 = shalt.err (!%p2082_p1)
}
  0x48   :  { %102 = dma.hbm_to_vmem [thread:$0]  %s2628_s9, 2048, %s97_s19, [#allocation17], %s2132_s24, %s2132_s24, %s2133_s25  }
  0x49   :  { %2112 = dma.done.wait [#allocation8], 2048  }
  0x4a   :  { %2113 = vsyncadd [#allocation8], 4294965248 }
  0x4b   :  { %2114 = dma.done.wait [#allocation11], 6272  }
  0x4c   :  { %2115 = vsyncadd [#allocation11], 4294961024 }
  0x4d   :  { %2116 = dma.done.wait [#allocation14], 8192  }
  0x4e   :  { %2117 = vsyncadd [#allocation14], 4294959104 }
  0x4f   :  { %2118 = dma.done.wait [#allocation17], 2048  }
  0x50   :  { %2119 = vsyncadd [#allocation17], 4294965248  ;;  %v2137_v0 = vmov 0.0   ;;  %v562_v1 = vld [vmem:[#allocation10] sm:$0xff]  ;;  %v189_v2 = vld [vmem:[#allocation12 + $0x170] sm:$0xff] }
  0x51   :  { %272 = vmatprep.mubr.f32.mxu0 %v2137_v0  ;;  %v188_v3 = vld [vmem:[#allocation12 + $0x168] sm:$0xff]  ;;  %563 = vst [vmem:[#allocation2] sm:$0xff] %v562_v1  ;;  %208 = vmatprep.subr.mxu0 %v189_v2  ;;  %v186_v4 = vld [vmem:[#allocation12 + $0x158] sm:$0xff]  ;;  %v185_v5 = vld [vmem:[#allocation12 + $0x150] sm:$0xff] }
  0x52   :  { %209 = vmatpush1.msra.mxu0 %v188_v3  ;;  %v183_v6 = vld [vmem:[#allocation12 + $0x140] sm:$0xff]  ;;  %v182_v7 = vld [vmem:[#allocation12 + $0x138] sm:$0xff]  ;;  %v180_v8 = vld [vmem:[#allocation12 + $0x128] sm:$0xff]  ;;  %v193_v3 = vlaneseq }
  0x53   :  { %210 = vmatprep.subr.mxu0 %v186_v4  ;;  %v179_v9 = vld [vmem:[#allocation12 + $0x120] sm:$0xff]  ;;  %v177_v10 = vld [vmem:[#allocation12 + $0x110] sm:$0xff]  ;;  %v176_v11 = vld [vmem:[#allocation12 + $0x108] sm:$0xff] }
  0x54   :  { %211 = vmatpush1.msra.mxu0 %v185_v5  ;;  %v174_v12 = vld [vmem:[#allocation12 + $0xf8] sm:$0xff]  ;;  %v173_v13 = vld [vmem:[#allocation12 + $0xf0] sm:$0xff]  ;;  %v171_v14 = vld [vmem:[#allocation12 + $0xe0] sm:$0xff]  ;;  %v2257_v4 = vshrl.u32 %v193_v3, 7 }
  0x55   :  { %212 = vmatprep.subr.mxu0 %v183_v6  ;;  %v190_v15 = vld [vmem:[#allocation12 + $0x178] sm:$0xff]  ;;  %v187_v17 = vld [vmem:[#allocation12 + $0x160] sm:$0xff]  ;;  %v168_v18 = vld [vmem:[#allocation12 + $0xc8] sm:$0xff] }
  0x56   :  { %213 = vmatpush1.msra.mxu0 %v182_v7  ;;  %v170_v16 = vld [vmem:[#allocation12 + $0xd8] sm:$0xff]  ;;  %1662 = vmatprep.subr.mxu1 %v190_v15  ;;  %v184_v19 = vld [vmem:[#allocation12 + $0x148] sm:$0xff]  ;;  %v167_v20 = vld [vmem:[#allocation12 + $0xc0] sm:$0xff]  ;;  %v195_v5 = vsub.s32 0, %v2257_v4  ;;  %v199_v7 = vsub.s32 1, %v2257_v4 }
  0x57   :  { %214 = vmatprep.subr.mxu0 %v180_v8  ;;  %1663 = vmatpush3.msra.mxu1 %v190_v15  ;;  %v165_v21 = vld [vmem:[#allocation12 + $0xb0] sm:$0xff]  ;;  %v164_v23 = vld [vmem:[#allocation12 + $0xa8] sm:$0xff]  ;;  %v162_v24 = vld [vmem:[#allocation12 + $0x98] sm:$0xff] }
  0x58   :  { %215 = vmatpush1.msra.mxu0 %v179_v9  ;;  %1664 = vmatprep.subr.mxu1 %v187_v17  ;;  %v181_v22 = vld [vmem:[#allocation12 + $0x130] sm:$0xff]  ;;  %v178_v25 = vld [vmem:[#allocation12 + $0x118] sm:$0xff]  ;;  %v159_v27 = vld [vmem:[#allocation12 + $0x80] sm:$0xff] }
  0x59   :  { %216 = vmatprep.subr.mxu0 %v177_v10  ;;  %1665 = vmatpush3.msra.mxu1 %v187_v17  ;;  %v161_v26 = vld [vmem:[#allocation12 + $0x90] sm:$0xff]  ;;  %v175_v28 = vld [vmem:[#allocation12 + $0x100] sm:$0xff]  ;;  %v158_v29 = vld [vmem:[#allocation12 + $0x78] sm:$0xff] }
  0x5a   :  { %217 = vmatpush1.msra.mxu0 %v176_v11  ;;  %1666 = vmatprep.subr.mxu1 %v184_v19  ;;  %v156_v30 = vld [vmem:[#allocation12 + $0x68] sm:$0xff]  ;;  %v155_v32 = vld [vmem:[#allocation12 + $0x60] sm:$0xff]  ;;  %v153_v33 = vld [vmem:[#allocation12 + $0x50] sm:$0xff] }
  0x5b   :  { %218 = vmatprep.subr.mxu0 %v174_v12  ;;  %1667 = vmatpush3.msra.mxu1 %v184_v19  ;;  %v172_v31 = vld [vmem:[#allocation12 + $0xe8] sm:$0xff]  ;;  %v169_v34 = vld [vmem:[#allocation12 + $0xd0] sm:$0xff]  ;;  %v150_v36 = vld [vmem:[#allocation12 + $0x38] sm:$0xff] }
  0x5c   :  { %219 = vmatpush1.msra.mxu0 %v173_v13  ;;  %1668 = vmatprep.subr.mxu1 %v181_v22  ;;  %v152_v35 = vld [vmem:[#allocation12 + $0x48] sm:$0xff]  ;;  %v166_v37 = vld [vmem:[#allocation12 + $0xb8] sm:$0xff]  ;;  %v149_v38 = vld [vmem:[#allocation12 + $0x30] sm:$0xff]  ;;  %v203_v13 = vsub.s32 2, %v2257_v4 }
  0x5d   :  { %220 = vmatprep.subr.mxu0 %v171_v14  ;;  %1669 = vmatpush3.msra.mxu1 %v181_v22  ;;  %v147_v39 = vld [vmem:[#allocation12 + $0x20] sm:$0xff]  ;;  %v146_v41 = vld [vmem:[#allocation12 + $0x18] sm:$0xff]  ;;  %v144_v42 = vld [vmem:[#allocation12 + $0x8] sm:$0xff] }
  0x5e   :  { %221 = vmatpush1.msra.mxu0 %v170_v16  ;;  %1670 = vmatprep.subr.mxu1 %v178_v25  ;;  %v163_v40 = vld [vmem:[#allocation12 + $0xa0] sm:$0xff]  ;;  %v160_v43 = vld [vmem:[#allocation12 + $0x88] sm:$0xff]  ;;  %v127_v45 = vld [vmem:[#allocation7] sm:$0xff] }
  0x5f   :  { %222 = vmatprep.subr.mxu0 %v168_v18  ;;  %1671 = vmatpush3.msra.mxu1 %v178_v25  ;;  %v143_v44 = vld [vmem:[#allocation12] sm:$0xff]  ;;  %v157_v46 = vld [vmem:[#allocation12 + $0x70] sm:$0xff]  ;;  %v154_v47 = vld [vmem:[#allocation12 + $0x58] sm:$0xff] }
  0x60   :  { %223 = vmatpush1.msra.mxu0 %v167_v20  ;;  %1672 = vmatprep.subr.mxu1 %v175_v28  ;;  %v128_v48 = vld [vmem:[#allocation7 + $0x8] sm:$0xff]  ;;  %v148_v50 = vld [vmem:[#allocation12 + $0x28] sm:$0xff]  ;;  %v145_v52 = vld [vmem:[#allocation12 + $0x10] sm:$0xff] }
  0x61   :  { %224 = vmatprep.subr.mxu0 %v165_v21  ;;  %1673 = vmatpush3.msra.mxu1 %v175_v28  ;;  %v151_v49 = vld [vmem:[#allocation12 + $0x40] sm:$0xff]  ;;  %v129_v51 = vld [vmem:[#allocation7 + $0x10] sm:$0xff]  ;;  %v130_v53 = vld [vmem:[#allocation7 + $0x18] sm:$0xff] }
  0x62   :  { %225 = vmatpush1.msra.mxu0 %v164_v23  ;;  %1674 = vmatprep.subr.mxu1 %v172_v31  ;;  %v131_v54 = vld [vmem:[#allocation7 + $0x20] sm:$0xff]  ;;  %v132_v55 = vld [vmem:[#allocation7 + $0x28] sm:$0xff]  ;;  %v133_v56 = vld [vmem:[#allocation7 + $0x30] sm:$0xff] }
  0x63   :  { %226 = vmatprep.subr.mxu0 %v162_v24  ;;  %1675 = vmatpush3.msra.mxu1 %v172_v31  ;;  %v134_v57 = vld [vmem:[#allocation7 + $0x38] sm:$0xff]  ;;  %v135_v58 = vld [vmem:[#allocation7 + $0x40] sm:$0xff]  ;;  %v136_v59 = vld [vmem:[#allocation7 + $0x48] sm:$0xff] }
  0x64   :  { %227 = vmatpush1.msra.mxu0 %v161_v26  ;;  %1676 = vmatprep.subr.mxu1 %v169_v34  ;;  %v137_v60 = vld [vmem:[#allocation7 + $0x50] sm:$0xff]  ;;  %v138_v61 = vld [vmem:[#allocation7 + $0x58] sm:$0xff]  ;;  %v139_v62 = vld [vmem:[#allocation7 + $0x60] sm:$0xff] }
  0x65   :  { %228 = vmatprep.subr.mxu0 %v159_v27  ;;  %1677 = vmatpush3.msra.mxu1 %v169_v34  ;;  %v141_v63 = vld [vmem:[#allocation7 + $0x70] sm:$0xff]  ;;  %v140_v1 = vld [vmem:[#allocation7 + $0x68] sm:$0xff]  ;;  %v142_v2 = vld [vmem:[#allocation7 + $0x78] sm:$0xff] }
  0x66   :  { %229 = vmatpush1.msra.mxu0 %v158_v29  ;;  %1678 = vmatprep.subr.mxu1 %v166_v37  ;;  %v191_v6 = vld [vmem:[%s2624_s5] sm:$0x7]  ;;  %s2325_s5 = smov 0  }
  0x67   :  { %230 = vmatprep.subr.mxu0 %v156_v30  ;;  %1679 = vmatpush3.msra.mxu1 %v166_v37  ;;  %v2266_v8 = vrot.slane %v191_v6, %v195_v5  ;;  %v2270_v9 = vrot.slane %v191_v6, %v199_v7  ;;  %v2279_v18 = vrot.slane %v191_v6, %v203_v13 }
  0x68   :  { %231 = vmatpush1.msra.mxu0 %v155_v32  ;;  %1680 = vmatprep.subr.mxu1 %v163_v40 }
  0x69   :  { %232 = vmatprep.subr.mxu0 %v153_v33  ;;  %1681 = vmatpush3.msra.mxu1 %v163_v40 }
  0x6a   :  { %233 = vmatpush1.msra.mxu0 %v152_v35  ;;  %1682 = vmatprep.subr.mxu1 %v160_v43 }
  0x6b   :  { %234 = vmatprep.subr.mxu0 %v150_v36  ;;  %1683 = vmatpush3.msra.mxu1 %v160_v43 }
  0x6c   :  { %235 = vmatpush1.msra.mxu0 %v149_v38  ;;  %1684 = vmatprep.subr.mxu1 %v157_v46 }
  0x6d   :  { %236 = vmatprep.subr.mxu0 %v147_v39  ;;  %1685 = vmatpush3.msra.mxu1 %v157_v46 }
  0x6e   :  { %237 = vmatpush1.msra.mxu0 %v146_v41  ;;  %1686 = vmatprep.subr.mxu1 %v154_v47 }
  0x6f   :  { %238 = vmatprep.subr.mxu0 %v144_v42  ;;  %1694 = vmatprep.mubr.f32.mxu1 %v127_v45 }
  0x70   :  { %239 = vmatpush1.msra.mxu0 %v143_v44  ;;  %1687 = vmatpush3.msra.mxu1 %v154_v47 }
  0x71   :  { %273 = vmatmul.mubr.f32.vlgmr.msra.gmra.mxu0 %v127_v45  ;;  %1688 = vmatprep.subr.mxu1 %v151_v49 }
  0x72   :  { %278 = vmatprep.mubr.f32.mxu0 %v2137_v0  ;;  %1689 = vmatpush3.msra.mxu1 %v151_v49 }
  0x73   :  { %1690 = vmatprep.subr.mxu1 %v148_v50 }
  0x74   :  { %1691 = vmatpush3.msra.mxu1 %v148_v50 }
  0x75   :  { %279 = vmatmul.mubr.f32.gmra.mxu0 %v128_v48  ;;  %1692 = vmatprep.subr.mxu1 %v145_v52 }
  0x76   :  { %284 = vmatprep.mubr.f32.mxu0 %v2137_v0  ;;  %1693 = vmatpush3.msra.mxu1 %v145_v52 }
  0x77   :  { %1695 = vmatmul.mubr.f32.vlgmr.msra.gmra.mxu1 %v128_v48 }
  0x78   :  { %1697 = vmatprep.mubr.f32.mxu1 %v129_v51 }
  0x79   :  { %285 = vmatmul.mubr.f32.gmra.mxu0 %v129_v51 }
  0x7a   :  { %290 = vmatprep.mubr.f32.mxu0 %v2137_v0 }
  0x7b   :  { %1698 = vmatmul.mubr.f32.gmra.mxu1 %v130_v53 }
  0x7c   :  { %1700 = vmatprep.mubr.f32.mxu1 %v131_v54 }
  0x7d   :  { %291 = vmatmul.mubr.f32.gmra.mxu0 %v130_v53 }
  0x7e   :  { %296 = vmatprep.mubr.f32.mxu0 %v2137_v0 }
  0x7f   :  { %1701 = vmatmul.mubr.f32.gmra.mxu1 %v132_v55 }
  0x80   :  { %1703 = vmatprep.mubr.f32.mxu1 %v133_v56 }
  0x81   :  { %297 = vmatmul.mubr.f32.gmra.mxu0 %v131_v54 }
  0x82   :  { %302 = vmatprep.mubr.f32.mxu0 %v2137_v0 }
  0x83   :  { %1704 = vmatmul.mubr.f32.gmra.mxu1 %v134_v57 }
  0x84   :  { %1706 = vmatprep.mubr.f32.mxu1 %v135_v58 }
  0x85   :  { %303 = vmatmul.mubr.f32.gmra.mxu0 %v132_v55 }
  0x86   :  { %308 = vmatprep.mubr.f32.mxu0 %v2137_v0 }
  0x87   :  { %1707 = vmatmul.mubr.f32.gmra.mxu1 %v136_v59 }
  0x88   :  { %1709 = vmatprep.mubr.f32.mxu1 %v137_v60 }
  0x89   :  { %309 = vmatmul.mubr.f32.gmra.mxu0 %v133_v56 }
  0x8a   :  { %314 = vmatprep.mubr.f32.mxu0 %v2137_v0 }
  0x8b   :  { %1710 = vmatmul.mubr.f32.gmra.mxu1 %v138_v61 }
  0x8c   :  { %1712 = vmatprep.mubr.f32.mxu1 %v139_v62 }
  0x8d   :  { %315 = vmatmul.mubr.f32.gmra.mxu0 %v134_v57 }
  0x8e   :  { %320 = vmatprep.mubr.f32.mxu0 %v2137_v0 }
  0x8f   :  { %1713 = vmatmul.mubr.f32.gmra.mxu1 %v140_v1 }
  0x90   :  { %1715 = vmatprep.mubr.f32.mxu1 %v141_v63 }
  0x91   :  { %321 = vmatmul.mubr.f32.gmra.mxu0 %v135_v58 }
  0x92   :  { %326 = vmatprep.mubr.f32.mxu0 %v2137_v0 }
  0x93   :  { %1716 = vmatmul.mubr.f32.gmra.mxu1 %v142_v2 }
  0x95   :  { %327 = vmatmul.mubr.f32.gmra.mxu0 %v136_v59 }
  0x96   :  { %332 = vmatprep.mubr.f32.mxu0 %v2137_v0 }
  0x99   :  { %333 = vmatmul.mubr.f32.gmra.mxu0 %v137_v60 }
  0x9a   :  { %338 = vmatprep.mubr.f32.mxu0 %v2137_v0 }
  0x9d   :  { %339 = vmatmul.mubr.f32.gmra.mxu0 %v138_v61 }
  0x9e   :  { %344 = vmatprep.mubr.f32.mxu0 %v2137_v0 }
  0xa1   :  { %345 = vmatmul.mubr.f32.gmra.mxu0 %v139_v62 }
  0xa2   :  { %350 = vmatprep.mubr.f32.mxu0 %v2137_v0 }
  0xa5   :  { %351 = vmatmul.mubr.f32.gmra.mxu0 %v140_v1 }
  0xa6   :  { %356 = vmatprep.mubr.f32.mxu0 %v2137_v0 }
  0xa9   :  { %357 = vmatmul.mubr.f32.gmra.mxu0 %v141_v63 }
  0xaa   :  { %362 = vmatprep.mubr.f32.mxu0 %v2137_v0 }
  0xad   :  { %363 = vmatmul.mubr.f32.gmra.mxu0 %v142_v2 }
 0x131   :  { %v274_v0 = vpop.f32.mrf.mxu0 }
 0x132   :  { %v275_v10 = vadd.f32 %v274_v0, %v2266_v8 }
 0x133   :  { %v276_v11 = vpop.f32.mrf.mxu0 }
 0x134   :  { %514 = vst [vmem:[#allocation3] sm:$0xff] %v275_v10  ;;  %v277_v12 = vadd.f32 %v276_v11, %v2270_v9 }
 0x135   :  { %v280_v14 = vpop.f32.mrf.mxu0 }
 0x136   :  { %515 = vst [vmem:[#allocation3 + $0x8] sm:$0xff] %v277_v12  ;;  %v281_v15 = vadd.f32 %v280_v14, %v2266_v8 }
 0x137   :  { %v282_v16 = vpop.f32.mrf.mxu0  ;;  %v1696_v22 = vpop.f32.mrf.mxu1 }
 0x138   :  { %517 = vst [vmem:[#allocation3 + $0x18] sm:$0xff] %v281_v15  ;;  %v283_v17 = vadd.f32 %v282_v16, %v2270_v9  ;;  %v441_v24 = vadd.f32 %v1696_v22, %v2279_v18 }
 0x139   :  { %v286_v19 = vpop.f32.mrf.mxu0  ;;  %v435_v26 = vpop.f32.mrf.mxu1 }
 0x13a   :  { %518 = vst [vmem:[#allocation3 + $0x20] sm:$0xff] %v283_v17  ;;  %v287_v20 = vadd.f32 %v286_v19, %v2266_v8  ;;  %519 = vst [vmem:[#allocation3 + $0x28] sm:$0xff] %v441_v24  ;;  %v436_v28 = vadd.f32 %v435_v26, %v2279_v18 }
 0x13b   :  { %v288_v21 = vpop.f32.mrf.mxu0  ;;  %v1699_v30 = vpop.f32.mrf.mxu1 }
 0x13c   :  { %520 = vst [vmem:[#allocation3 + $0x30] sm:$0xff] %v287_v20  ;;  %v289_v23 = vadd.f32 %v288_v21, %v2270_v9  ;;  %516 = vst [vmem:[#allocation3 + $0x10] sm:$0xff] %v436_v28  ;;  %v451_v32 = vadd.f32 %v1699_v30, %v2279_v18 }
 0x13d   :  { %v292_v25 = vpop.f32.mrf.mxu0  ;;  %v445_v34 = vpop.f32.mrf.mxu1 }
 0x13e   :  { %521 = vst [vmem:[#allocation3 + $0x38] sm:$0xff] %v289_v23  ;;  %v293_v27 = vadd.f32 %v292_v25, %v2266_v8  ;;  %525 = vst [vmem:[#allocation3 + $0x58] sm:$0xff] %v451_v32  ;;  %v446_v36 = vadd.f32 %v445_v34, %v2279_v18 }
 0x13f   :  { %v294_v29 = vpop.f32.mrf.mxu0  ;;  %v1702_v38 = vpop.f32.mrf.mxu1 }
 0x140   :  { %523 = vst [vmem:[#allocation3 + $0x48] sm:$0xff] %v293_v27  ;;  %v295_v31 = vadd.f32 %v294_v29, %v2270_v9  ;;  %522 = vst [vmem:[#allocation3 + $0x40] sm:$0xff] %v446_v36  ;;  %v461_v40 = vadd.f32 %v1702_v38, %v2279_v18 }
 0x141   :  { %v298_v33 = vpop.f32.mrf.mxu0  ;;  %v455_v42 = vpop.f32.mrf.mxu1 }
 0x142   :  { %524 = vst [vmem:[#allocation3 + $0x50] sm:$0xff] %v295_v31  ;;  %v299_v35 = vadd.f32 %v298_v33, %v2266_v8  ;;  %531 = vst [vmem:[#allocation3 + $0x88] sm:$0xff] %v461_v40  ;;  %v456_v44 = vadd.f32 %v455_v42, %v2279_v18 }
 0x143   :  { %v300_v37 = vpop.f32.mrf.mxu0  ;;  %v1705_v46 = vpop.f32.mrf.mxu1 }
 0x144   :  { %526 = vst [vmem:[#allocation3 + $0x60] sm:$0xff] %v299_v35  ;;  %v301_v39 = vadd.f32 %v300_v37, %v2270_v9  ;;  %528 = vst [vmem:[#allocation3 + $0x70] sm:$0xff] %v456_v44  ;;  %v471_v48 = vadd.f32 %v1705_v46, %v2279_v18 }
 0x145   :  { %v304_v41 = vpop.f32.mrf.mxu0  ;;  %v465_v50 = vpop.f32.mrf.mxu1 }
 0x146   :  { %527 = vst [vmem:[#allocation3 + $0x68] sm:$0xff] %v301_v39  ;;  %v305_v43 = vadd.f32 %v304_v41, %v2266_v8  ;;  %537 = vst [vmem:[#allocation3 + $0xb8] sm:$0xff] %v471_v48  ;;  %v466_v52 = vadd.f32 %v465_v50, %v2279_v18 }
 0x147   :  { %v306_v45 = vpop.f32.mrf.mxu0  ;;  %v1708_v54 = vpop.f32.mrf.mxu1 }
 0x148   :  { %529 = vst [vmem:[#allocation3 + $0x78] sm:$0xff] %v305_v43  ;;  %v307_v47 = vadd.f32 %v306_v45, %v2270_v9  ;;  %534 = vst [vmem:[#allocation3 + $0xa0] sm:$0xff] %v466_v52  ;;  %v481_v56 = vadd.f32 %v1708_v54, %v2279_v18 }
 0x149   :  { %v310_v49 = vpop.f32.mrf.mxu0  ;;  %v475_v58 = vpop.f32.mrf.mxu1 }
 0x14a   :  { %530 = vst [vmem:[#allocation3 + $0x80] sm:$0xff] %v307_v47  ;;  %v311_v51 = vadd.f32 %v310_v49, %v2266_v8  ;;  %543 = vst [vmem:[#allocation3 + $0xe8] sm:$0xff] %v481_v56  ;;  %v476_v60 = vadd.f32 %v475_v58, %v2279_v18 }
 0x14b   :  { %v312_v53 = vpop.f32.mrf.mxu0  ;;  %v1711_v62 = vpop.f32.mrf.mxu1 }
 0x14c   :  { %532 = vst [vmem:[#allocation3 + $0x90] sm:$0xff] %v311_v51  ;;  %v313_v55 = vadd.f32 %v312_v53, %v2270_v9  ;;  %540 = vst [vmem:[#allocation3 + $0xd0] sm:$0xff] %v476_v60  ;;  %v491_v1 = vadd.f32 %v1711_v62, %v2279_v18 }
 0x14d   :  { %v316_v57 = vpop.f32.mrf.mxu0  ;;  %v485_v3 = vpop.f32.mrf.mxu1 }
 0x14e   :  { %533 = vst [vmem:[#allocation3 + $0x98] sm:$0xff] %v313_v55  ;;  %v317_v59 = vadd.f32 %v316_v57, %v2266_v8  ;;  %549 = vst [vmem:[#allocation3 + $0x118] sm:$0xff] %v491_v1  ;;  %v486_v0 = vadd.f32 %v485_v3, %v2279_v18 }
 0x14f   :  { %v318_v61 = vpop.f32.mrf.mxu0  ;;  %v1714_v11 = vpop.f32.mrf.mxu1 }
 0x150   :  { %535 = vst [vmem:[#allocation3 + $0xa8] sm:$0xff] %v317_v59  ;;  %v319_v63 = vadd.f32 %v318_v61, %v2270_v9  ;;  %546 = vst [vmem:[#allocation3 + $0x100] sm:$0xff] %v486_v0  ;;  %v501_v14 = vadd.f32 %v1714_v11, %v2279_v18 }
 0x151   :  { %v322_v2 = vpop.f32.mrf.mxu0  ;;  %v495_v16 = vpop.f32.mrf.mxu1 }
 0x152   :  { %536 = vst [vmem:[#allocation3 + $0xb0] sm:$0xff] %v319_v63  ;;  %v323_v6 = vadd.f32 %v322_v2, %v2266_v8  ;;  %555 = vst [vmem:[#allocation3 + $0x148] sm:$0xff] %v501_v14  ;;  %v496_v19 = vadd.f32 %v495_v16, %v2279_v18 }
 0x153   :  { %v324_v10 = vpop.f32.mrf.mxu0  ;;  %v1717_v21 = vpop.f32.mrf.mxu1 }
 0x154   :  { %538 = vst [vmem:[#allocation3 + $0xc0] sm:$0xff] %v323_v6  ;;  %v325_v12 = vadd.f32 %v324_v10, %v2270_v9  ;;  %552 = vst [vmem:[#allocation3 + $0x130] sm:$0xff] %v496_v19  ;;  %v511_v23 = vadd.f32 %v1717_v21, %v2279_v18 }
 0x155   :  { %v328_v15 = vpop.f32.mrf.mxu0  ;;  %v505_v25 = vpop.f32.mrf.mxu1 }
 0x156   :  { %539 = vst [vmem:[#allocation3 + $0xc8] sm:$0xff] %v325_v12  ;;  %v329_v17 = vadd.f32 %v328_v15, %v2266_v8  ;;  %561 = vst [vmem:[#allocation3 + $0x178] sm:$0xff] %v511_v23  ;;  %v506_v27 = vadd.f32 %v505_v25, %v2279_v18 }
 0x157   :  { %v330_v20 = vpop.f32.mrf.mxu0 }
 0x158   :  { %541 = vst [vmem:[#allocation3 + $0xd8] sm:$0xff] %v329_v17  ;;  %v331_v22 = vadd.f32 %v330_v20, %v2270_v9  ;;  %558 = vst [vmem:[#allocation3 + $0x160] sm:$0xff] %v506_v27 }
 0x159   :  { %v334_v24 = vpop.f32.mrf.mxu0 }
 0x15a   :  { %542 = vst [vmem:[#allocation3 + $0xe0] sm:$0xff] %v331_v22  ;;  %v335_v26 = vadd.f32 %v334_v24, %v2266_v8 }
 0x15b   :  { %v336_v28 = vpop.f32.mrf.mxu0 }
 0x15c   :  { %544 = vst [vmem:[#allocation3 + $0xf0] sm:$0xff] %v335_v26  ;;  %v337_v29 = vadd.f32 %v336_v28, %v2270_v9 }
 0x15d   :  { %v340_v30 = vpop.f32.mrf.mxu0 }
 0x15e   :  { %545 = vst [vmem:[#allocation3 + $0xf8] sm:$0xff] %v337_v29  ;;  %v341_v31 = vadd.f32 %v340_v30, %v2266_v8 }
 0x15f   :  { %v342_v32 = vpop.f32.mrf.mxu0 }
 0x160   :  { %547 = vst [vmem:[#allocation3 + $0x108] sm:$0xff] %v341_v31  ;;  %v343_v33 = vadd.f32 %v342_v32, %v2270_v9 }
 0x161   :  { %v346_v34 = vpop.f32.mrf.mxu0 }
 0x162   :  { %548 = vst [vmem:[#allocation3 + $0x110] sm:$0xff] %v343_v33  ;;  %v347_v35 = vadd.f32 %v346_v34, %v2266_v8 }
 0x163   :  { %v348_v36 = vpop.f32.mrf.mxu0 }
 0x164   :  { %550 = vst [vmem:[#allocation3 + $0x120] sm:$0xff] %v347_v35  ;;  %v349_v18 = vadd.f32 %v348_v36, %v2270_v9 }
 0x165   :  { %v352_v37 = vpop.f32.mrf.mxu0 }
 0x166   :  { %551 = vst [vmem:[#allocation3 + $0x128] sm:$0xff] %v349_v18  ;;  %v353_v38 = vadd.f32 %v352_v37, %v2266_v8 }
 0x167   :  { %v354_v39 = vpop.f32.mrf.mxu0 }
 0x168   :  { %553 = vst [vmem:[#allocation3 + $0x138] sm:$0xff] %v353_v38  ;;  %v355_v40 = vadd.f32 %v354_v39, %v2270_v9 }
 0x169   :  { %v358_v41 = vpop.f32.mrf.mxu0 }
 0x16a   :  { %554 = vst [vmem:[#allocation3 + $0x140] sm:$0xff] %v355_v40  ;;  %v359_v42 = vadd.f32 %v358_v41, %v2266_v8 }
 0x16b   :  { %v360_v43 = vpop.f32.mrf.mxu0 }
 0x16c   :  { %556 = vst [vmem:[#allocation3 + $0x150] sm:$0xff] %v359_v42  ;;  %v361_v44 = vadd.f32 %v360_v43, %v2270_v9 }
 0x16d   :  { %v364_v45 = vpop.f32.mrf.mxu0 }
 0x16e   :  { %557 = vst [vmem:[#allocation3 + $0x158] sm:$0xff] %v361_v44  ;;  %v365_v46 = vadd.f32 %v364_v45, %v2266_v8 }
 0x16f   :  { %v366_v47 = vpop.f32.mrf.mxu0 }
 0x170   :  { %559 = vst [vmem:[#allocation3 + $0x168] sm:$0xff] %v365_v46  ;;  %v367_v48 = vadd.f32 %v366_v47, %v2270_v9 }
 0x172   :  { %560 = vst [vmem:[#allocation3 + $0x170] sm:$0xff] %v367_v48 }
 0x173 LB: > { %v617_v49 = vld [vmem:[#allocation13 + $0x170] sm:$0xff]  ;;  %v616_v50 = vld [vmem:[#allocation13 + $0x168] sm:$0xff]  ;;  %v614_v51 = vld [vmem:[#allocation13 + $0x158] sm:$0xff]  ;;  %v2138_v53 = vmov 0.0   ;;  %vm2139_vm0 = vmmov 0   ;;  %s1548_s21 = smul.u32 24, %s2124_s5  ;;  %s2124_s5 = sphi %s2325_s5, %s569_s5  }
 0x174   : > { %636 = vmatprep.subr.mxu0 %v617_v49  ;;  %v613_v52 = vld [vmem:[#allocation13 + $0x150] sm:$0xff]  ;;  %1718 = vmatprep.subr.mxu1 %v2138_v53  ;;  %v611_v8 = vld [vmem:[#allocation13 + $0x140] sm:$0xff]  ;;  %v610_v9 = vld [vmem:[#allocation13 + $0x138] sm:$0xff]  ;;  %s802_s27 = sld [smem:[#allocation6 + %s2124_s5]]  ;;  %s1543_s28 = sshll.u32 %s2124_s5, 3 }
 0x175   : > { %637 = vmatpush1.msra.mxu0 %v616_v50  ;;  %700 = vmatprep.mubr.f32.mxu0 %v2138_v53  ;;  %v608_v54 = vld [vmem:[#allocation13 + $0x128] sm:$0xff]  ;;  %v607_v55 = vld [vmem:[#allocation13 + $0x120] sm:$0xff]  ;;  %v605_v56 = vld [vmem:[#allocation13 + $0x110] sm:$0xff]  ;;  %s779_s26 = scalar_lea.vmem [#allocation3], %s1548_s21  ;;  %s808_s29 = scalar_lea.vmem [#allocation4], %s1543_s28 }
 0x176   : > { %638 = vmatprep.subr.mxu0 %v614_v51  ;;  %1750 = vmatprep.mubr.msk.f32.mxu1 %vm2139_vm0, %v2138_v53  ;;  %v604_v57 = vld [vmem:[#allocation13 + $0x108] sm:$0xff]  ;;  %v618_v58 = vld [vmem:[#allocation13 + $0x178] sm:$0xff]  ;;  %v615_v60 = vld [vmem:[#allocation13 + $0x160] sm:$0xff]  ;;  %s569_s5 = sadd.s32 1, %s2124_s5  }
 0x177   : > { %639 = vmatpush1.msra.mxu0 %v613_v52  ;;  %v602_v59 = vld [vmem:[#allocation13 + $0xf8] sm:$0xff]  ;;  %1719 = vmatpush3.msra.mxu1 %v618_v58  ;;  %v601_v61 = vld [vmem:[#allocation13 + $0xf0] sm:$0xff]  ;;  %v612_v62 = vld [vmem:[#allocation13 + $0x148] sm:$0xff]  ;;  %p566_p2 = scmp.ge.s32.totalorder %s569_s5, 16  }
 0x178   : > { %640 = vmatprep.subr.mxu0 %v611_v8  ;;  %1720 = vmatprep.subr.mxu1 %v2138_v53  ;;  %v599_v63 = vld [vmem:[#allocation13 + $0xe0] sm:$0xff]  ;;  %v598_v1 = vld [vmem:[#allocation13 + $0xd8] sm:$0xff]  ;;  %v609_v2 = vld [vmem:[#allocation13 + $0x130] sm:$0xff] }
 0x179   : > { %641 = vmatpush1.msra.mxu0 %v610_v9  ;;  %1721 = vmatpush3.msra.mxu1 %v615_v60  ;;  %v596_v3 = vld [vmem:[#allocation13 + $0xc8] sm:$0xff]  ;;  %v595_v6 = vld [vmem:[#allocation13 + $0xc0] sm:$0xff]  ;;  %v606_v0 = vld [vmem:[#allocation13 + $0x118] sm:$0xff] }
 0x17a   : > { %642 = vmatprep.subr.mxu0 %v608_v54  ;;  %1722 = vmatprep.subr.mxu1 %v2138_v53  ;;  %v593_v10 = vld [vmem:[#allocation13 + $0xb0] sm:$0xff]  ;;  %v592_v11 = vld [vmem:[#allocation13 + $0xa8] sm:$0xff]  ;;  %v603_v12 = vld [vmem:[#allocation13 + $0x100] sm:$0xff] }
 0x17b   : > { %643 = vmatpush1.msra.mxu0 %v607_v55  ;;  %1723 = vmatpush3.msra.mxu1 %v612_v62  ;;  %v590_v14 = vld [vmem:[#allocation13 + $0x98] sm:$0xff]  ;;  %v589_v15 = vld [vmem:[#allocation13 + $0x90] sm:$0xff]  ;;  %v600_v16 = vld [vmem:[#allocation13 + $0xe8] sm:$0xff] }
 0x17c   : > { %644 = vmatprep.subr.mxu0 %v605_v56  ;;  %1724 = vmatprep.subr.mxu1 %v2138_v53  ;;  %v587_v17 = vld [vmem:[#allocation13 + $0x80] sm:$0xff]  ;;  %v586_v19 = vld [vmem:[#allocation13 + $0x78] sm:$0xff]  ;;  %v597_v20 = vld [vmem:[#allocation13 + $0xd0] sm:$0xff] }
 0x17d   : > { %645 = vmatpush1.msra.mxu0 %v604_v57  ;;  %1725 = vmatpush3.msra.mxu1 %v609_v2  ;;  %v584_v21 = vld [vmem:[#allocation13 + $0x68] sm:$0xff]  ;;  %v583_v22 = vld [vmem:[#allocation13 + $0x60] sm:$0xff]  ;;  %v594_v23 = vld [vmem:[#allocation13 + $0xb8] sm:$0xff] }
 0x17e   : > { %646 = vmatprep.subr.mxu0 %v602_v59  ;;  %1726 = vmatprep.subr.mxu1 %v2138_v53  ;;  %v581_v24 = vld [vmem:[#allocation13 + $0x50] sm:$0xff]  ;;  %v580_v25 = vld [vmem:[#allocation13 + $0x48] sm:$0xff]  ;;  %v591_v26 = vld [vmem:[#allocation13 + $0xa0] sm:$0xff] }
 0x17f   : > { %647 = vmatpush1.msra.mxu0 %v601_v61  ;;  %1727 = vmatpush3.msra.mxu1 %v606_v0  ;;  %v578_v27 = vld [vmem:[#allocation13 + $0x38] sm:$0xff]  ;;  %v577_v28 = vld [vmem:[#allocation13 + $0x30] sm:$0xff]  ;;  %v588_v29 = vld [vmem:[#allocation13 + $0x88] sm:$0xff] }
 0x180   : > { %648 = vmatprep.subr.mxu0 %v599_v63  ;;  %1728 = vmatprep.subr.mxu1 %v2138_v53  ;;  %v575_v30 = vld [vmem:[#allocation13 + $0x20] sm:$0xff]  ;;  %v574_v31 = vld [vmem:[#allocation13 + $0x18] sm:$0xff]  ;;  %v585_v32 = vld [vmem:[#allocation13 + $0x70] sm:$0xff]  ;;  %v803_v63 = vstv %s802_s27 }
 0x181   : > { %649 = vmatpush1.msra.mxu0 %v598_v1  ;;  %1729 = vmatpush3.msra.mxu1 %v603_v12  ;;  %v572_v33 = vld [vmem:[#allocation13 + $0x8] sm:$0xff]  ;;  %v571_v34 = vld [vmem:[#allocation13] sm:$0xff]  ;;  %v582_v35 = vld [vmem:[#allocation13 + $0x58] sm:$0xff]  ;;  %vm804_vm1 = vcmp.lt.s32.totalorder %v2257_v4, %v803_v63 }
 0x182   : > { %650 = vmatprep.subr.mxu0 %v596_v3  ;;  %1730 = vmatprep.subr.mxu1 %v2138_v53  ;;  %v570_v36 = vld [vmem:[#allocation2] sm:$0xff]  ;;  %v579_v18 = vld [vmem:[#allocation13 + $0x40] sm:$0xff]  ;;  %v576_v37 = vld [vmem:[#allocation13 + $0x28] sm:$0xff] }
 0x183   : > { %651 = vmatpush1.msra.mxu0 %v595_v6  ;;  %1731 = vmatpush3.msra.mxu1 %v600_v16  ;;  %v573_v38 = vld [vmem:[#allocation13 + $0x10] sm:$0xff]  ;;  %v781_v49 = vld [vmem:[%s779_s26 + $0x8] sm:$0xff]  ;;  %v782_v57 = vld [vmem:[%s779_s26 + $0x10] sm:$0xff] }
 0x184   : > { %652 = vmatprep.subr.mxu0 %v593_v10  ;;  %1732 = vmatprep.subr.mxu1 %v2138_v53  ;;  %v619_v39 = vld [vmem:[%s2625_s6] sm:$0x7] }
 0x185   : > { %653 = vmatpush1.msra.mxu0 %v592_v11  ;;  %1733 = vmatpush3.msra.mxu1 %v597_v20  ;;  %v624_v40 = vrot.slane %v619_v39, %v195_v5  ;;  %v780_v42 = vld [vmem:[%s779_s26] sm:$0xff]  ;;  %v628_v44 = vrot.slane %v619_v39, %v199_v7  ;;  %v632_v8 = vrot.slane %v619_v39, %v203_v13  ;;  %v1025_v11 = vld [vmem:[#allocation16 + $0x78] sm:$0xff] (%p566_p2)  ;;  %v1019_v7 = vld [vmem:[#allocation16 + $0x48] sm:$0xff] (%p566_p2) }
 0x186   : > { %654 = vmatprep.subr.mxu0 %v590_v14  ;;  %1734 = vmatprep.subr.mxu1 %v2138_v53  ;;  %v1024_v12 = vld [vmem:[#allocation16 + $0x70] sm:$0xff] (%p566_p2)  ;;  %v1023_v14 = vld [vmem:[#allocation16 + $0x68] sm:$0xff] (%p566_p2)  ;;  %v1021_v20 = vld [vmem:[#allocation16 + $0x58] sm:$0xff] (%p566_p2) }
 0x187   : > { %655 = vmatpush1.msra.mxu0 %v589_v15  ;;  %1735 = vmatpush3.msra.mxu1 %v594_v23  ;;  %v857_v15 = vld [vmem:[#allocation15 + $0x78] sm:$0xff] (%p566_p2)  ;;  %v856_v16 = vld [vmem:[#allocation15 + $0x70] sm:$0xff] (%p566_p2)  ;;  %v851_v23 = vld [vmem:[#allocation15 + $0x48] sm:$0xff] (%p566_p2) }
 0x188   : > { %656 = vmatprep.subr.mxu0 %v587_v17  ;;  %1736 = vmatprep.subr.mxu1 %v2138_v53  ;;  %v1022_v17 = vld [vmem:[#allocation16 + $0x60] sm:$0xff] (%p566_p2)  ;;  %v1020_v4 = vld [vmem:[#allocation16 + $0x50] sm:$0xff] (%p566_p2)  ;;  %v853_v5 = vld [vmem:[#allocation15 + $0x58] sm:$0xff] (%p566_p2) }
 0x189   : > { %657 = vmatpush1.msra.mxu0 %v586_v19  ;;  %1737 = vmatpush3.msra.mxu1 %v591_v26  ;;  %v855_v19 = vld [vmem:[#allocation15 + $0x68] sm:$0xff] (%p566_p2)  ;;  %v852_v13 = vld [vmem:[#allocation15 + $0x50] sm:$0xff] (%p566_p2) }
 0x18a   : > { %658 = vmatprep.subr.mxu0 %v584_v21  ;;  %1738 = vmatprep.subr.mxu1 %v2138_v53  ;;  %v854_v21 = vld [vmem:[#allocation15 + $0x60] sm:$0xff] (%p566_p2)  ;;  %v1016_v26 = vld [vmem:[#allocation16 + $0x30] sm:$0xff] (%p566_p2) }
 0x18b   : > { %659 = vmatpush1.msra.mxu0 %v583_v22  ;;  %1739 = vmatpush3.msra.mxu1 %v588_v29  ;;  %v1018_v22 = vld [vmem:[#allocation16 + $0x40] sm:$0xff] (%p566_p2)  ;;  %v849_v29 = vld [vmem:[#allocation15 + $0x38] sm:$0xff] (%p566_p2) }
 0x18c   : > { %660 = vmatprep.subr.mxu0 %v581_v24  ;;  %1740 = vmatprep.subr.mxu1 %v2138_v53  ;;  %v1017_v24 = vld [vmem:[#allocation16 + $0x38] sm:$0xff] (%p566_p2) }
 0x18d   : > { %661 = vmatpush1.msra.mxu0 %v580_v25  ;;  %1741 = vmatpush3.msra.mxu1 %v585_v32  ;;  %v1013_v32 = vld [vmem:[#allocation16 + $0x18] sm:$0xff] (%p566_p2) }
 0x18e   : > { %662 = vmatprep.subr.mxu0 %v578_v27  ;;  %1742 = vmatprep.subr.mxu1 %v2138_v53  ;;  %v850_v27 = vld [vmem:[#allocation15 + $0x40] sm:$0xff] (%p566_p2) }
 0x18f   : > { %663 = vmatpush1.msra.mxu0 %v577_v28  ;;  %1743 = vmatpush3.msra.mxu1 %v582_v35  ;;  %v1015_v28 = vld [vmem:[#allocation16 + $0x28] sm:$0xff] (%p566_p2)  ;;  %v846_v35 = vld [vmem:[#allocation15 + $0x20] sm:$0xff] (%p566_p2) }
 0x190   : > { %664 = vmatprep.subr.mxu0 %v575_v30  ;;  %1744 = vmatprep.subr.mxu1 %v2138_v53  ;;  %v1014_v30 = vld [vmem:[#allocation16 + $0x20] sm:$0xff] (%p566_p2) }
 0x191   : > { %665 = vmatpush1.msra.mxu0 %v574_v31  ;;  %1745 = vmatpush3.msra.mxu1 %v579_v18  ;;  %v848_v31 = vld [vmem:[#allocation15 + $0x30] sm:$0xff] (%p566_p2)  ;;  %v845_v18 = vld [vmem:[#allocation15 + $0x18] sm:$0xff] (%p566_p2) }
 0x192   : > { %666 = vmatprep.subr.mxu0 %v572_v33  ;;  %1746 = vmatprep.subr.mxu1 %v2138_v53  ;;  %v847_v33 = vld [vmem:[#allocation15 + $0x28] sm:$0xff] (%p566_p2) }
 0x193   : > { %667 = vmatpush1.msra.mxu0 %v571_v34  ;;  %1747 = vmatpush3.msra.mxu1 %v576_v37  ;;  %v1012_v34 = vld [vmem:[#allocation16 + $0x10] sm:$0xff] (%p566_p2)  ;;  %v1010_v37 = vld [vmem:[#allocation16] sm:$0xff] (%p566_p2) }
 0x194   : > { %701 = vmatmul.mubr.f32.vlgmr.msra.gmra.mxu0 %v570_v36  ;;  %1748 = vmatprep.subr.mxu1 %v2138_v53 }
 0x195   : > { %1749 = vmatpush3.msra.mxu1 %v573_v38  ;;  %1753 = vmatprep.subr.mxu0 (%p566_p2), %v857_v15  ;;  %v844_v38 = vld [vmem:[#allocation15 + $0x10] sm:$0xff] (%p566_p2) }
 0x196   : > { %1751 = vmatmul.mubr.f32.vlgmr.msra.gmra.mxu1 %v570_v36  ;;  %1809 = vmatprep.subr.mxu1 (%p566_p2), %v1025_v11 }
 0x197   :  { %1810 = vmatpush3.msra.mxu1 (%p566_p2), %v1025_v11  ;;  %1754 = vmatpush3.msra.mxu0 (%p566_p2), %v857_v15 }
 0x198   :  { %1811 = vmatprep.subr.mxu1 (%p566_p2), %v1024_v12  ;;  %1755 = vmatprep.subr.mxu0 (%p566_p2), %v856_v16 }
 0x199   :  { %1812 = vmatpush3.msra.mxu1 (%p566_p2), %v1024_v12  ;;  %1756 = vmatpush3.msra.mxu0 (%p566_p2), %v856_v16 }
 0x19a   :  { %1813 = vmatprep.subr.mxu1 (%p566_p2), %v1023_v14  ;;  %1757 = vmatprep.subr.mxu0 (%p566_p2), %v855_v19 }
 0x19b   :  { %1814 = vmatpush3.msra.mxu1 (%p566_p2), %v1023_v14  ;;  %1758 = vmatpush3.msra.mxu0 (%p566_p2), %v855_v19 }
 0x19c   :  { %1815 = vmatprep.subr.mxu1 (%p566_p2), %v1022_v17  ;;  %1759 = vmatprep.subr.mxu0 (%p566_p2), %v854_v21 }
 0x19d   :  { %1816 = vmatpush3.msra.mxu1 (%p566_p2), %v1022_v17  ;;  %1760 = vmatpush3.msra.mxu0 (%p566_p2), %v854_v21 }
 0x19e   :  { %1817 = vmatprep.subr.mxu1 (%p566_p2), %v1021_v20  ;;  %1761 = vmatprep.subr.mxu0 (%p566_p2), %v853_v5 }
 0x19f   :  { %1818 = vmatpush3.msra.mxu1 (%p566_p2), %v1021_v20  ;;  %1762 = vmatpush3.msra.mxu0 (%p566_p2), %v853_v5 }
 0x1a0   :  { %1819 = vmatprep.subr.mxu1 (%p566_p2), %v1020_v4  ;;  %1763 = vmatprep.subr.mxu0 (%p566_p2), %v852_v13 }
 0x1a1   :  { %1820 = vmatpush3.msra.mxu1 (%p566_p2), %v1020_v4  ;;  %1764 = vmatpush3.msra.mxu0 (%p566_p2), %v852_v13 }
 0x1a2   :  { %1821 = vmatprep.subr.mxu1 (%p566_p2), %v1019_v7  ;;  %1765 = vmatprep.subr.mxu0 (%p566_p2), %v851_v23 }
 0x1a3   :  { %1822 = vmatpush3.msra.mxu1 (%p566_p2), %v1019_v7  ;;  %1766 = vmatpush3.msra.mxu0 (%p566_p2), %v851_v23  ;;  %v2384_v23 = vld [vmem:[%s2627_s8] ss:$0 sm:$0xff] (%p566_p2) }
 0x1a4   :  { %1823 = vmatprep.subr.mxu1 (%p566_p2), %v1018_v22  ;;  %1767 = vmatprep.subr.mxu0 (%p566_p2), %v850_v27 }
 0x1a5   :  { %1824 = vmatpush3.msra.mxu1 (%p566_p2), %v1018_v22  ;;  %1768 = vmatpush3.msra.mxu0 (%p566_p2), %v850_v27 }
 0x1a6   :  { %1825 = vmatprep.subr.mxu1 (%p566_p2), %v1017_v24  ;;  %1769 = vmatprep.subr.mxu0 (%p566_p2), %v849_v29 }
 0x1a7   :  { %1826 = vmatpush3.msra.mxu1 (%p566_p2), %v1017_v24  ;;  %1770 = vmatpush3.msra.mxu0 (%p566_p2), %v849_v29 }
 0x1a8   :  { %1827 = vmatprep.subr.mxu1 (%p566_p2), %v1016_v26  ;;  %1771 = vmatprep.subr.mxu0 (%p566_p2), %v848_v31 }
 0x1a9   :  { %1828 = vmatpush3.msra.mxu1 (%p566_p2), %v1016_v26  ;;  %1772 = vmatpush3.msra.mxu0 (%p566_p2), %v848_v31 }
 0x1aa   :  { %1829 = vmatprep.subr.mxu1 (%p566_p2), %v1015_v28  ;;  %1773 = vmatprep.subr.mxu0 (%p566_p2), %v847_v33 }
 0x1ab   :  { %1830 = vmatpush3.msra.mxu1 (%p566_p2), %v1015_v28  ;;  %1774 = vmatpush3.msra.mxu0 (%p566_p2), %v847_v33 }
 0x1ac   :  { %1831 = vmatprep.subr.mxu1 (%p566_p2), %v1014_v30  ;;  %1775 = vmatprep.subr.mxu0 (%p566_p2), %v846_v35 }
 0x1ad   :  { %1832 = vmatpush3.msra.mxu1 (%p566_p2), %v1014_v30  ;;  %1776 = vmatpush3.msra.mxu0 (%p566_p2), %v846_v35 }
 0x1ae   :  { %1833 = vmatprep.subr.mxu1 (%p566_p2), %v1013_v32  ;;  %1777 = vmatprep.subr.mxu0 (%p566_p2), %v845_v18 }
 0x1af   :  { %1834 = vmatpush3.msra.mxu1 (%p566_p2), %v1013_v32  ;;  %1778 = vmatpush3.msra.mxu0 (%p566_p2), %v845_v18 }
 0x1b0   :  { %1835 = vmatprep.subr.mxu1 (%p566_p2), %v1012_v34  ;;  %1779 = vmatprep.subr.mxu0 (%p566_p2), %v844_v38 }
 0x1b1   :  { %1836 = vmatpush3.msra.mxu1 (%p566_p2), %v1012_v34  ;;  %1780 = vmatpush3.msra.mxu0 (%p566_p2), %v844_v38 }
 0x254   : > { %v702_v41 = vpop.f32.mrf.mxu0 }
 0x255   : > { %v703_v43 = vadd.f32 %v702_v41, %v624_v40  ;;  %v843_v40 = vld [vmem:[#allocation15 + $0x8] sm:$0xff] (%p566_p2) }
 0x256   : > { %v704_v45 = vpop.f32.mrf.mxu0  ;;  %v773_v50 = vpop.f32.mrf.mxu1  ;;  %1781 = vmatprep.subr.mxu0 (%p566_p2), %v843_v40 }
 0x257   : > { %v783_v46 = vadd.f32 %v780_v42, %v703_v43  ;;  %v705_v48 = vadd.f32 %v704_v45, %v628_v44  ;;  %v774_v54 = vadd.f32 %v773_v50, %v632_v8  ;;  %v842_v42 = vld [vmem:[#allocation15] sm:$0xff] (%p566_p2)  ;;  %1782 = vmatpush3.msra.mxu0 (%p566_p2), %v843_v40 }
 0x258   : > { %v1752_v51 = vpop.f32.mrf.mxu1  ;;  %1783 = vmatprep.subr.mxu0 (%p566_p2), %v842_v42 }
 0x259   : > { %v784_v47 = vmul.f32 0.5, %v783_v46  ;;  %v788_v52 = vadd.f32 %v781_v49, %v705_v48  ;;  %1784 = vmatpush3.msra.mxu0 (%p566_p2), %v842_v42 }
 0x25b   : > { %1888 = vtanh.f32 %v784_v47  ;;  %v789_v53 = vmul.f32 0.5, %v788_v52 }
 0x25d   : > { %1890 = vtanh.f32 %v789_v53 }
 0x268   : > { %v1889_v9 = vpop.eup %1888 }
 0x269   : > { %v786_v55 = vadd.f32 1.0, %v1889_v9 }
 0x26a   : > { %v1891_v60 = vpop.eup %1890 }
 0x26b   : > { %v787_v56 = vmul.f32 0.5, %v786_v55  ;;  %v791_v61 = vadd.f32 1.0, %v1891_v60 }
 0x26d   : > { %v793_v58 = vmul.f32 %v787_v56, %v774_v54  ;;  %v792_v62 = vmul.f32 0.5, %v791_v61  ;;  %v2367_v54 = vld [vmem:[%s2629_s10] ss:$0 sm:$0xff] (%p566_p2) }
 0x26f   : > { %v794_v59 = vadd.f32 %v793_v58, %v782_v57  ;;  %v796_v1 = vsub.f32 1.0, %v792_v62  ;;  %v798_v3 = vmul.f32 %v792_v62, %v570_v36 }
 0x271   : > { %1892 = vtanh.f32 %v794_v59 }
 0x27e   : > { %v1893_v2 = vpop.eup %1892 }
 0x27f   : > { %v797_v6 = vmul.f32 %v1893_v2, %v796_v1 }
 0x280   :  { %568 = sbr.rel (!%p566_p2) target bundleno = 371 (0x173), region = 101 }
 0x281   : > { %v799_v0 = vadd.f32 %v798_v3, %v797_v6 }
 0x283   : > { %v805_v10 = vsel %vm804_vm1, %v799_v0, %v570_v36  ;;  %v1011_v36 = vld [vmem:[#allocation16 + $0x8] sm:$0xff] (%p566_p2) }
 0x284   : > { %806 = vst [vmem:[#allocation2] sm:$0xff] %v805_v10  ;;  %809 = vst [vmem:[%s808_s29] sm:$0xff] %v805_v10  ;;  %1837 = vmatprep.subr.mxu1 (%p566_p2), %v1011_v36 }
 0x285   :  { %1838 = vmatpush3.msra.mxu1 %v1011_v36 }
 0x286   :  { %1839 = vmatprep.subr.mxu1 %v1010_v37 }
 0x287   :  { %1840 = vmatpush3.msra.mxu1 %v1010_v37 }
 0x28b   :  { %v810_v25 = vld [vmem:[#allocation4] sm:$0xff]  ;;  %v811_v39 = vld [vmem:[#allocation4 + $0x8] sm:$0xff]  ;;  %v812_v41 = vld [vmem:[#allocation4 + $0x10] sm:$0xff] }
 0x28c   :  { %1841 = vmatprep.mubr.f32.mxu1 %v810_v25  ;;  %v813_v43 = vld [vmem:[#allocation4 + $0x18] sm:$0xff]  ;;  %v814_v44 = vld [vmem:[#allocation4 + $0x20] sm:$0xff]  ;;  %1785 = vmatprep.mubr.f32.mxu0 %v810_v25  ;;  %v815_v45 = vld [vmem:[#allocation4 + $0x28] sm:$0xff] }
 0x28d   :  { %1842 = vmatmul.mubr.f32.vlgmr.msra.gmra.mxu1 %v811_v39  ;;  %1786 = vmatmul.mubr.f32.vlgmr.msra.gmra.mxu0 %v811_v39  ;;  %v816_v46 = vld [vmem:[#allocation4 + $0x30] sm:$0xff]  ;;  %v817_v47 = vld [vmem:[#allocation4 + $0x38] sm:$0xff]  ;;  %v818_v48 = vld [vmem:[#allocation4 + $0x40] sm:$0xff] }
 0x28e   :  { %1844 = vmatprep.mubr.f32.mxu1 %v812_v41  ;;  %1788 = vmatprep.mubr.f32.mxu0 %v812_v41  ;;  %v819_v49 = vld [vmem:[#allocation4 + $0x48] sm:$0xff]  ;;  %v820_v50 = vld [vmem:[#allocation4 + $0x50] sm:$0xff]  ;;  %v821_v51 = vld [vmem:[#allocation4 + $0x58] sm:$0xff] }
 0x28f   :  { %v822_v52 = vld [vmem:[#allocation4 + $0x60] sm:$0xff]  ;;  %v823_v53 = vld [vmem:[#allocation4 + $0x68] sm:$0xff]  ;;  %v824_v8 = vld [vmem:[#allocation4 + $0x70] sm:$0xff] }
 0x290   :  { %v825_v9 = vld [vmem:[#allocation4 + $0x78] sm:$0xff] }
 0x291   :  { %1845 = vmatmul.mubr.f32.gmra.mxu1 %v813_v43  ;;  %1789 = vmatmul.mubr.f32.gmra.mxu0 %v813_v43 }
 0x292   :  { %1847 = vmatprep.mubr.f32.mxu1 %v814_v44  ;;  %1791 = vmatprep.mubr.f32.mxu0 %v814_v44 }
 0x295   :  { %1848 = vmatmul.mubr.f32.gmra.mxu1 %v815_v45  ;;  %1792 = vmatmul.mubr.f32.gmra.mxu0 %v815_v45 }
 0x296   :  { %1850 = vmatprep.mubr.f32.mxu1 %v816_v46  ;;  %1794 = vmatprep.mubr.f32.mxu0 %v816_v46 }
 0x299   :  { %1851 = vmatmul.mubr.f32.gmra.mxu1 %v817_v47  ;;  %1795 = vmatmul.mubr.f32.gmra.mxu0 %v817_v47 }
 0x29a   :  { %1853 = vmatprep.mubr.f32.mxu1 %v818_v48  ;;  %1797 = vmatprep.mubr.f32.mxu0 %v818_v48 }
 0x29d   :  { %1854 = vmatmul.mubr.f32.gmra.mxu1 %v819_v49  ;;  %1798 = vmatmul.mubr.f32.gmra.mxu0 %v819_v49  ;;  %v827_v49 = vld [vmem:[#allocation7 + $0x8] sm:$0xff] }
 0x29e   :  { %1856 = vmatprep.mubr.f32.mxu1 %v820_v50  ;;  %1800 = vmatprep.mubr.f32.mxu0 %v820_v50 }
 0x2a1   :  { %1857 = vmatmul.mubr.f32.gmra.mxu1 %v821_v51  ;;  %1801 = vmatmul.mubr.f32.gmra.mxu0 %v821_v51 }
 0x2a2   :  { %1859 = vmatprep.mubr.f32.mxu1 %v822_v52  ;;  %1803 = vmatprep.mubr.f32.mxu0 %v822_v52 }
 0x2a5   :  { %1860 = vmatmul.mubr.f32.gmra.mxu1 %v823_v53  ;;  %1804 = vmatmul.mubr.f32.gmra.mxu0 %v823_v53 }
 0x2a6   :  { %1862 = vmatprep.mubr.f32.mxu1 %v824_v8  ;;  %1806 = vmatprep.mubr.f32.mxu0 %v824_v8 }
 0x2a9   :  { %1863 = vmatmul.mubr.f32.gmra.mxu1 %v825_v9  ;;  %1807 = vmatmul.mubr.f32.gmra.mxu0 %v825_v9 }
 0x34d   :  { %v1843_v55 = vpop.f32.mrf.mxu1  ;;  %v1787_v61 = vpop.f32.mrf.mxu0 }
 0x34e   :  { %v1105_v56 = vadd.f32 %v1843_v55, %v2367_v54  ;;  %v937_v29 = vadd.f32 %v1787_v61, %v2384_v23 }
 0x34f   :  { %v1099_v57 = vpop.f32.mrf.mxu1  ;;  %v931_v2 = vpop.f32.mrf.mxu0 }
 0x350   :  { %v1179_v58 = vmul.f32 0.5, %v1105_v56  ;;  %v1100_v59 = vadd.f32 %v2367_v54, %v1099_v57  ;;  %v932_v41 = vadd.f32 %v2384_v23, %v931_v2 }
 0x351   :  { %v1846_v60 = vpop.f32.mrf.mxu1  ;;  %v1790_v10 = vpop.f32.mrf.mxu0 }
 0x352   :  { %1894 = vtanh.f32 %v1179_v58  ;;  %v1178_v62 = vmul.f32 0.5, %v1100_v59  ;;  %v1115_v63 = vadd.f32 %v1846_v60, %v2367_v54  ;;  %v947_v43 = vadd.f32 %v1790_v10, %v2384_v23 }
 0x353   :  { %v1109_v1 = vpop.f32.mrf.mxu1  ;;  %v941_v15 = vpop.f32.mrf.mxu0 }
 0x354   :  { %1896 = vtanh.f32 %v1178_v62  ;;  %v1181_v3 = vmul.f32 0.5, %v1115_v63  ;;  %v1110_v6 = vadd.f32 %v2367_v54, %v1109_v1  ;;  %v942_v59 = vadd.f32 %v2384_v23, %v941_v15  ;;  %v826_v62 = vld [vmem:[#allocation7] sm:$0xff] }
 0x355   :  { %v1849_v0 = vpop.f32.mrf.mxu1  ;;  %v2375_v20 = vpop.f32.mrf.mxu0 }
 0x356   :  { %1898 = vtanh.f32 %v1181_v3  ;;  %v1180_v11 = vmul.f32 0.5, %v1110_v6  ;;  %v1125_v12 = vadd.f32 %v1849_v0, %v2367_v54  ;;  %v829_v0 = vld [vmem:[#allocation7 + $0x18] sm:$0xff] }
 0x357   :  { %v1119_v14 = vpop.f32.mrf.mxu1  ;;  %v2378_v7 = vpop.f32.mrf.mxu0 }
 0x358   :  { %1900 = vtanh.f32 %v1180_v11  ;;  %v1183_v16 = vmul.f32 0.5, %v1125_v12  ;;  %v1120_v17 = vadd.f32 %v2367_v54, %v1119_v14  ;;  %v957_v11 = vadd.f32 %v2375_v20, %v2384_v23 }
 0x359   :  { %v1852_v19 = vpop.f32.mrf.mxu1  ;;  %v2386_v25 = vpop.f32.mrf.mxu0  ;;  %v952_v15 = vadd.f32 %v2384_v23, %v2378_v7  ;;  %v828_v7 = vld [vmem:[#allocation7 + $0x10] sm:$0xff] }
 0x35a   :  { %1902 = vtanh.f32 %v1183_v16  ;;  %v1182_v21 = vmul.f32 0.5, %v1120_v17  ;;  %v1135_v4 = vadd.f32 %v1852_v19, %v2367_v54 }
 0x35b   :  { %v1129_v5 = vpop.f32.mrf.mxu1  ;;  %v2390_v31 = vpop.f32.mrf.mxu0 }
 0x35c   :  { %1904 = vtanh.f32 %v1182_v21  ;;  %v1185_v13 = vmul.f32 0.5, %v1135_v4  ;;  %v1130_v22 = vadd.f32 %v2367_v54, %v1129_v5 }
 0x35d   :  { %v1855_v24 = vpop.f32.mrf.mxu1  ;;  %v2393_v18 = vpop.f32.mrf.mxu0 }
 0x35e   :  { %1906 = vtanh.f32 %v1185_v13  ;;  %v1184_v26 = vmul.f32 0.5, %v1130_v22  ;;  %v1145_v27 = vadd.f32 %v1855_v24, %v2367_v54 }
 0x35f   :  { %v1895_v28 = vpop.eup %1894  ;;  %v1139_v30 = vpop.f32.mrf.mxu1 }
 0x360   :  { %1908 = vtanh.f32 %v1184_v26  ;;  %v1187_v32 = vmul.f32 0.5, %v1145_v27  ;;  %v1211_v33 = vadd.f32 1.0, %v1895_v28  ;;  %v1140_v34 = vadd.f32 %v2367_v54, %v1139_v30  ;;  %v2398_v45 = vpop.f32.mrf.mxu0 }
 0x361   :  { %v1897_v35 = vpop.eup %1896  ;;  %v1858_v36 = vpop.f32.mrf.mxu1 }
 0x362   :  { %1910 = vtanh.f32 %v1187_v32  ;;  %v1227_v37 = vmul.f32 0.5, %v1211_v33  ;;  %v1186_v38 = vmul.f32 0.5, %v1140_v34  ;;  %v1210_v39 = vadd.f32 1.0, %v1897_v35  ;;  %v2405_v63 = vpop.f32.mrf.mxu0 }
 0x363   :  { %v1899_v40 = vpop.eup %1898  ;;  %v1155_v42 = vadd.f32 %v1858_v36, %v2367_v54  ;;  %v1149_v44 = vpop.f32.mrf.mxu1  ;;  %v967_v32 = vadd.f32 %v2386_v25, %v2384_v23  ;;  %v962_v34 = vadd.f32 %v2384_v23, %v2390_v31  ;;  %v830_v36 = vld [vmem:[#allocation7 + $0x20] sm:$0xff] }
 0x364   :  { %v1243_v46 = vmul.f32 %v1227_v37, %v937_v29  ;;  %1912 = vtanh.f32 %v1186_v38  ;;  %v1226_v47 = vmul.f32 0.5, %v1210_v39  ;;  %v1213_v48 = vadd.f32 1.0, %v1899_v40  ;;  %v981_v26 = vpop.f32.mrf.mxu0 }
 0x365   :  { %v1901_v50 = vpop.eup %1900  ;;  %v1189_v51 = vmul.f32 0.5, %v1155_v42  ;;  %v1150_v52 = vadd.f32 %v2367_v54, %v1149_v44  ;;  %v1861_v53 = vpop.f32.mrf.mxu1  ;;  %v831_v44 = vld [vmem:[#allocation7 + $0x28] sm:$0xff] }
 0x366   :  { %v1242_v8 = vmul.f32 %v1226_v47, %v932_v41  ;;  %v1229_v9 = vmul.f32 0.5, %v1213_v48  ;;  %v1212_v55 = vadd.f32 1.0, %v1901_v50  ;;  %v1165_v56 = vadd.f32 %v1861_v53, %v2367_v54  ;;  %v1805_v41 = vpop.f32.mrf.mxu0  ;;  %v832_v47 = vld [vmem:[#allocation7 + $0x30] sm:$0xff] }
 0x367   :  { %v1903_v57 = vpop.eup %1902  ;;  %1914 = vtanh.f32 %v1189_v51  ;;  %v1188_v58 = vmul.f32 0.5, %v1150_v52  ;;  %v1159_v60 = vpop.f32.mrf.mxu1  ;;  %v2403_v61 = vadd.f32 %v1243_v46, %v827_v49  ;;  %v972_v48 = vadd.f32 %v2384_v23, %v2398_v45  ;;  %v834_v45 = vld [vmem:[#allocation7 + $0x40] sm:$0xff] }
 0x368   :  { %v1245_v1 = vmul.f32 %v1229_v9, %v947_v43  ;;  %v1228_v2 = vmul.f32 0.5, %v1212_v55  ;;  %v1191_v3 = vmul.f32 0.5, %v1165_v56  ;;  %v1160_v6 = vadd.f32 %v2367_v54, %v1159_v60 }
 0x369   :  { %v1905_v10 = vpop.eup %1904  ;;  %1916 = vtanh.f32 %v1188_v58  ;;  %1276 = vadd.xlane.f32.xlu0 %v2403_v61  ;;  %v1215_v12 = vadd.f32 1.0, %v1903_v57  ;;  %v1864_v14 = vpop.f32.mrf.mxu1  ;;  %v2414_v19 = vadd.f32 %v1242_v8, %v826_v62  ;;  %v977_v51 = vadd.f32 %v2393_v18, %v2384_v23  ;;  %v833_v57 = vld [vmem:[#allocation7 + $0x38] sm:$0xff] }
 0x36a   :  { %1918 = vtanh.f32 %v1191_v3  ;;  %v1190_v16 = vmul.f32 0.5, %v1160_v6  ;;  %v1175_v17 = vadd.f32 %v1864_v14, %v2367_v54  ;;  %v1244_v4 = vmul.f32 %v1228_v2, %v942_v59  ;;  %v991_v8 = vpop.f32.mrf.mxu0  ;;  %v835_v14 = vld [vmem:[#allocation7 + $0x48] sm:$0xff] }
 0x36b   :  { %v1907_v21 = vpop.eup %1906  ;;  %v1231_v5 = vmul.f32 0.5, %v1215_v12  ;;  %v1214_v13 = vadd.f32 1.0, %v1905_v10  ;;  %v1169_v22 = vpop.f32.mrf.mxu1  ;;  %v2416_v24 = vadd.f32 %v1245_v1, %v829_v0  ;;  %v987_v18 = vadd.f32 %v2405_v63, %v2384_v23 }
 0x36c   :  { %1920 = vtanh.f32 %v1190_v16  ;;  %v1193_v20 = vmul.f32 0.5, %v1175_v17  ;;  %v1170_v27 = vadd.f32 %v2367_v54, %v1169_v22  ;;  %v1217_v28 = vadd.f32 1.0, %v1907_v21  ;;  %v1808_v10 = vpop.f32.mrf.mxu0 }
 0x36d   :  { %v1909_v29 = vpop.eup %1908  ;;  %v1230_v30 = vmul.f32 0.5, %v1214_v13  ;;  %1280 = vadd.xlane.f32.xlu1 %v2416_v24  ;;  %1274 = vadd.xlane.f32.xlu0 %v2414_v19  ;;  %v1247_v54 = vmul.f32 %v1231_v5, %v957_v11  ;;  %v2425_v40 = vadd.f32 %v1244_v4, %v828_v7  ;;  %v982_v62 = vadd.f32 %v2384_v23, %v981_v26  ;;  %v836_v4 = vld [vmem:[#allocation7 + $0x50] sm:$0xff] }
 0x36e   :  { %1922 = vtanh.f32 %v1193_v20  ;;  %v1192_v33 = vmul.f32 0.5, %v1170_v27  ;;  %v1216_v35 = vadd.f32 1.0, %v1909_v29  ;;  %v1233_v39 = vmul.f32 0.5, %v1217_v28  ;;  %v1001_v27 = vpop.f32.mrf.mxu0  ;;  %v837_v29 = vld [vmem:[#allocation7 + $0x58] sm:$0xff] }
 0x36f   :  { %v1911_v37 = vpop.eup %1910  ;;  %v1246_v38 = vmul.f32 %v1230_v30, %v952_v15  ;;  %v2435_v53 = vadd.f32 %v1247_v54, %v831_v44  ;;  %v997_v63 = vadd.f32 %v1805_v41, %v2384_v23  ;;  %v992_v17 = vadd.f32 %v2384_v23, %v991_v8  ;;  %v840_v44 = vld [vmem:[#allocation7 + $0x70] sm:$0xff] }
 0x370   :  { %1924 = vtanh.f32 %v1192_v33  ;;  %v1232_v42 = vmul.f32 0.5, %v1216_v35  ;;  %v1219_v43 = vadd.f32 1.0, %v1911_v37  ;;  %v1249_v50 = vmul.f32 %v1233_v39, %v967_v32  ;;  %v838_v33 = vld [vmem:[#allocation7 + $0x60] sm:$0xff] }
 0x371   :  { %v1913_v46 = vpop.eup %1912  ;;  %1278 = vadd.xlane.f32.xlu1 %v2425_v40  ;;  %v2428_v25 = vadd.f32 %v1246_v38, %v830_v36  ;;  %v1002_v35 = vadd.f32 %v2384_v23, %v1001_v27  ;;  %v1007_v54 = vadd.f32 %v1808_v10, %v2384_v23  ;;  %v841_v23 = vld [vmem:[#allocation7 + $0x78] sm:$0xff] }
 0x372   :  { %v1248_v31 = vmul.f32 %v1232_v42, %v962_v34  ;;  %v1218_v49 = vadd.f32 1.0, %v1913_v46  ;;  %v1235_v52 = vmul.f32 0.5, %v1219_v43  ;;  %v2444_v0 = vadd.f32 %v1249_v50, %v833_v57  ;;  %v839_v43 = vld [vmem:[#allocation7 + $0x68] sm:$0xff] }
 0x373   :  { %1282 = vadd.xlane.f32.xlu0 %v2428_v25 }
 0x374   :  { %v1915_v9 = vpop.eup %1914  ;;  %v1234_v55 = vmul.f32 0.5, %v1218_v49  ;;  %v2437_v56 = vadd.f32 %v1248_v31, %v832_v47  ;;  %v1251_v2 = vmul.f32 %v1235_v52, %v977_v51 }
 0x375   :  { %1284 = vadd.xlane.f32.xlu1 %v2435_v53  ;;  %v1221_v58 = vadd.f32 1.0, %v1915_v9 }
 0x376   :  { %v1917_v59 = vpop.eup %1916  ;;  %v1250_v60 = vmul.f32 %v1234_v55, %v972_v48  ;;  %v2452_v20 = vadd.f32 %v1251_v2, %v835_v14 }
 0x377   :  { %v1919_v1 = vpop.eup %1918  ;;  %v1237_v3 = vmul.f32 0.5, %v1221_v58  ;;  %1286 = vadd.xlane.f32.xlu0 %v2437_v56  ;;  %v1220_v6 = vadd.f32 1.0, %v1917_v59 }
 0x378   :  { %v1223_v11 = vadd.f32 1.0, %v1919_v1  ;;  %v2446_v12 = vadd.f32 %v1250_v60, %v834_v45 }
 0x379   :  { %v1921_v15 = vpop.eup %1920  ;;  %v1236_v16 = vmul.f32 0.5, %v1220_v6  ;;  %1288 = vadd.xlane.f32.xlu1 %v2444_v0  ;;  %v1253_v13 = vmul.f32 %v1237_v3, %v987_v18 }
 0x37a   :  { %v1222_v21 = vadd.f32 1.0, %v1921_v15  ;;  %v1239_v26 = vmul.f32 0.5, %v1223_v11 }
 0x37b   :  { %v1923_v5 = vpop.eup %1922  ;;  %v1252_v22 = vmul.f32 %v1236_v16, %v982_v62  ;;  %1290 = vadd.xlane.f32.xlu0 %v2446_v12  ;;  %v2460_v39 = vadd.f32 %v1253_v13, %v837_v29 }
 0x37c   :  { %v1238_v28 = vmul.f32 0.5, %v1222_v21  ;;  %v1225_v7 = vadd.f32 1.0, %v1923_v5  ;;  %v1255_v37 = vmul.f32 %v1239_v26, %v997_v63 }
 0x37d   :  { %v1925_v30 = vpop.eup %1924  ;;  %1292 = vadd.xlane.f32.xlu1 %v2452_v20  ;;  %v2455_v32 = vadd.f32 %v1252_v22, %v836_v4 }
 0x37e   :  { %v1254_v34 = vmul.f32 %v1238_v28, %v992_v17  ;;  %v1224_v36 = vadd.f32 1.0, %v1925_v30  ;;  %v1241_v38 = vmul.f32 0.5, %v1225_v7  ;;  %v2466_v31 = vadd.f32 %v1255_v37, %v839_v43 }
 0x37f   :  { %1294 = vadd.xlane.f32.xlu0 %v2455_v32 }
 0x380   :  { %v1240_v41 = vmul.f32 0.5, %v1224_v36  ;;  %v2462_v42 = vadd.f32 %v1254_v34, %v838_v33  ;;  %v1257_v47 = vmul.f32 %v1241_v38, %v1007_v54 }
 0x381   :  { %1296 = vadd.xlane.f32.xlu1 %v2460_v39 }
 0x382   :  { %v1256_v46 = vmul.f32 %v1240_v41, %v1002_v35  ;;  %v2472_v49 = vadd.f32 %v1257_v47, %v841_v23 }
 0x383   :  { %1298 = vadd.xlane.f32.xlu0 %v2462_v42 }
 0x384   :  { %v2468_v48 = vadd.f32 %v1256_v46, %v840_v44 }
 0x385   :  { %1300 = vadd.xlane.f32.xlu1 %v2466_v31 }
 0x387   :  { %1302 = vadd.xlane.f32.xlu0 %v2468_v48 }
 0x389   :  { %1304 = vadd.xlane.f32.xlu1 %v2472_v49 }
 0x3f2   :  { %v1277_v50 = vpop.xlane.xlu0 %1276 }
 0x3f3   :  { %v1308_v51 = vmul.f32 0.0078125, %v1277_v50 }
 0x3f5   :  { %v2476_v52 = vsub.f32 %v2403_v61, %v1308_v51 }
 0x3f6   :  { %v1281_v8 = vpop.xlane.xlu1 %1280  ;;  %v1275_v9 = vpop.xlane.xlu0 %1274 }
 0x3f7   :  { %v1310_v55 = vmul.f32 0.0078125, %v1281_v8  ;;  %v1307_v57 = vmul.f32 0.0078125, %v1275_v9  ;;  %v1340_v58 = vmul.f32 %v2476_v52, %v2476_v52 }
 0x3f9   :  { %v2481_v45 = vsub.f32 %v2416_v24, %v1310_v55  ;;  %v2484_v59 = vsub.f32 %v2414_v19, %v1307_v57  ;;  %1357 = vadd.xlane.f32.xlu1 %v1340_v58 }
 0x3fa   :  { %v1279_v60 = vpop.xlane.xlu1 %1278 }
 0x3fb   :  { %v1309_v18 = vmul.f32 0.0078125, %v1279_v60  ;;  %v1342_v61 = vmul.f32 %v2481_v45, %v2481_v45  ;;  %v1339_v62 = vmul.f32 %v2484_v59, %v2484_v59 }
 0x3fc   :  { %v1283_v1 = vpop.xlane.xlu0 %1282 }
 0x3fd   :  { %v2491_v2 = vsub.f32 %v2425_v40, %v1309_v18  ;;  %v1311_v3 = vmul.f32 0.0078125, %v1283_v1  ;;  %1361 = vadd.xlane.f32.xlu1 %v1342_v61  ;;  %1355 = vadd.xlane.f32.xlu0 %v1339_v62 }
 0x3fe   :  { %v1285_v24 = vpop.xlane.xlu1 %1284 }
 0x3ff   :  { %v2494_v19 = vsub.f32 %v2428_v25, %v1311_v3  ;;  %v1312_v6 = vmul.f32 0.0078125, %v1285_v24  ;;  %v1341_v10 = vmul.f32 %v2491_v2, %v2491_v2 }
 0x400   :  { %v1287_v11 = vpop.xlane.xlu0 %1286 }
 0x401   :  { %v2499_v14 = vsub.f32 %v2435_v53, %v1312_v6  ;;  %v1313_v15 = vmul.f32 0.0078125, %v1287_v11  ;;  %1359 = vadd.xlane.f32.xlu0 %v1341_v10  ;;  %v1343_v25 = vmul.f32 %v2494_v19, %v2494_v19 }
 0x402   :  { %v1289_v16 = vpop.xlane.xlu1 %1288 }
 0x403   :  { %v2502_v40 = vsub.f32 %v2437_v56, %v1313_v15  ;;  %v1314_v63 = vmul.f32 0.0078125, %v1289_v16  ;;  %v1344_v17 = vmul.f32 %v2499_v14, %v2499_v14 }
 0x404   :  { %v1291_v21 = vpop.xlane.xlu0 %1290 }
 0x405   :  { %v2509_v4 = vsub.f32 %v2444_v0, %v1314_v63  ;;  %v1315_v5 = vmul.f32 0.0078125, %v1291_v21  ;;  %1365 = vadd.xlane.f32.xlu1 %v1344_v17  ;;  %1363 = vadd.xlane.f32.xlu0 %v1343_v25  ;;  %v1345_v26 = vmul.f32 %v2502_v40, %v2502_v40 }
 0x406   :  { %v1293_v53 = vpop.xlane.xlu1 %1292 }
 0x407   :  { %v2512_v13 = vsub.f32 %v2446_v12, %v1315_v5  ;;  %v1316_v56 = vmul.f32 0.0078125, %v1293_v53  ;;  %v1346_v22 = vmul.f32 %v2509_v4, %v2509_v4  ;;  %v2558_v5 = vld [vmem:[%s2630_s11] ss:$0 sm:$0xff]  ;;  %s2140_s11 = smov [#allocation18]  }
 0x408   :  { %v1295_v27 = vpop.xlane.xlu0 %1294 }
 0x409   :  { %v2519_v28 = vsub.f32 %v2452_v20, %v1316_v56  ;;  %v1317_v0 = vmul.f32 0.0078125, %v1295_v27  ;;  %1369 = vadd.xlane.f32.xlu1 %v1346_v22  ;;  %1367 = vadd.xlane.f32.xlu0 %v1345_v26  ;;  %v1347_v33 = vmul.f32 %v2512_v13, %v2512_v13  ;;  %v2564_v26 = vld [vmem:[%s2631_s12] ss:$0 sm:$0xff]  ;;  %s1518_s12 = sshll.u32 %s2140_s11, 4  ;;  %s1519_s12 = int_to_ptr.vmem [resolvable:$true] %s1518_s12 }
 0x40a   :  { %v1297_v7 = vpop.xlane.xlu1 %1296  ;;  %s2086_s16 = scalar_lea.vmem %s1519_s12, 2048  ;;  %p2091_p4 = scmp.lt.s32.totalorder %s1519_s12, %s1519_s12 }
 0x40b   :  { %v2522_v29 = vsub.f32 %v2455_v32, %v1317_v0  ;;  %v1318_v12 = vmul.f32 0.0078125, %v1297_v7  ;;  %v1348_v30 = vmul.f32 %v2519_v28, %v2519_v28  ;;  %p2087_p3 = scmp.ne.s32.totalorder %s1519_s12, %s2086_s16  ;;  %p2092_p5 = scmp.lt.s32.totalorder %s2086_s16, %s2086_s16 }
 0x40c   :  { %v1299_v34 = vpop.xlane.xlu0 %1298 }
 0x40d   :  { %v2529_v35 = vsub.f32 %v2460_v39, %v1318_v12  ;;  %v1319_v20 = vmul.f32 0.0078125, %v1299_v34  ;;  %1373 = vadd.xlane.f32.xlu1 %v1348_v30  ;;  %1371 = vadd.xlane.f32.xlu0 %v1347_v33  ;;  %v1349_v38 = vmul.f32 %v2522_v29, %v2522_v29  ;;  %p2093_p6 = por %p2092_p5, %p2091_p4 }
 0x40e   :  { %v1301_v36 = vpop.xlane.xlu1 %1300 }
 0x40f   :  { %v2532_v37 = vsub.f32 %v2462_v42, %v1319_v20  ;;  %v1320_v32 = vmul.f32 0.0078125, %v1301_v36  ;;  %v1350_v54 = vmul.f32 %v2529_v35, %v2529_v35  ;;  %p2094_p7 = pnand %p2093_p6, %p2087_p3 }
 0x410   :  { %v1303_v41 = vpop.xlane.xlu0 %1302 }
 0x411   :  { %v2539_v43 = vsub.f32 %v2466_v31, %v1320_v32  ;;  %v1321_v39 = vmul.f32 0.0078125, %v1303_v41  ;;  %1377 = vadd.xlane.f32.xlu1 %v1350_v54  ;;  %1375 = vadd.xlane.f32.xlu0 %v1349_v38  ;;  %v1351_v23 = vmul.f32 %v2532_v37, %v2532_v37 }
 0x412   :  { %v1305_v44 = vpop.xlane.xlu1 %1304 }
 0x413   :  { %v2542_v46 = vsub.f32 %v2468_v48, %v1321_v39  ;;  %v1322_v42 = vmul.f32 0.0078125, %v1305_v44  ;;  %v1352_v47 = vmul.f32 %v2539_v43, %v2539_v43 }
 0x415   :  { %v2549_v50 = vsub.f32 %v2472_v49, %v1322_v42  ;;  %1381 = vadd.xlane.f32.xlu1 %v1352_v47  ;;  %1379 = vadd.xlane.f32.xlu0 %v1351_v23  ;;  %v1353_v51 = vmul.f32 %v2542_v46, %v2542_v46 }
 0x417   :  { %v1354_v31 = vmul.f32 %v2549_v50, %v2549_v50 }
 0x419   :  { %1385 = vadd.xlane.f32.xlu1 %v1354_v31  ;;  %1383 = vadd.xlane.f32.xlu0 %v1353_v51 }
 0x482   :  { %v1358_v48 = vpop.xlane.xlu1 %1357 }
 0x483   :  { %v1388_v8 = vmul.f32 0.0078125, %v1358_v48 }
 0x485   :  { %v1404_v9 = vadd.f32 1e-05, %v1388_v8 }
 0x486   :  { %v1362_v55 = vpop.xlane.xlu1 %1361  ;;  %v1356_v57 = vpop.xlane.xlu0 %1355 }
 0x487   :  { %1926 = vrsqrt.f32 %v1404_v9  ;;  %v1390_v58 = vmul.f32 0.0078125, %v1362_v55  ;;  %v1387_v60 = vmul.f32 0.0078125, %v1356_v57 }
 0x489   :  { %v1406_v49 = vadd.f32 1e-05, %v1390_v58  ;;  %v1403_v18 = vadd.f32 1e-05, %v1387_v60 }
 0x48a   :  { %v1360_v61 = vpop.xlane.xlu0 %1359 }
 0x48b   :  { %1928 = vrsqrt.f32 %v1406_v49  ;;  %v1389_v62 = vmul.f32 0.0078125, %v1360_v61 }
 0x48c   :  { %1930 = vrsqrt.f32 %v1403_v18 }
 0x48d   :  { %v1405_v1 = vadd.f32 1e-05, %v1389_v62 }
 0x48e   :  { %v1366_v3 = vpop.xlane.xlu1 %1365  ;;  %v1364_v24 = vpop.xlane.xlu0 %1363 }
 0x48f   :  { %1932 = vrsqrt.f32 %v1405_v1  ;;  %v1392_v6 = vmul.f32 0.0078125, %v1366_v3  ;;  %v1391_v10 = vmul.f32 0.0078125, %v1364_v24 }
 0x491   :  { %v1408_v11 = vadd.f32 1e-05, %v1392_v6  ;;  %v1407_v15 = vadd.f32 1e-05, %v1391_v10 }
 0x492   :  { %v1370_v16 = vpop.xlane.xlu1 %1369  ;;  %v1368_v63 = vpop.xlane.xlu0 %1367 }
 0x493   :  { %1934 = vrsqrt.f32 %v1408_v11  ;;  %v1394_v17 = vmul.f32 0.0078125, %v1370_v16  ;;  %v1393_v25 = vmul.f32 0.0078125, %v1368_v63 }
 0x494   :  { %v1927_v21 = vpop.eup %1926  ;;  %1936 = vrsqrt.f32 %v1407_v15 }
 0x495   :  { %v1436_v53 = vmul.f32 %v1927_v21, %v2476_v52  ;;  %v1410_v56 = vadd.f32 1e-05, %v1394_v17  ;;  %v1409_v22 = vadd.f32 1e-05, %v1393_v25 }
 0x496   :  { %v1374_v27 = vpop.xlane.xlu1 %1373  ;;  %v1372_v0 = vpop.xlane.xlu0 %1371 }
 0x497   :  { %v1459_v7 = vmul.f32 %v2558_v5, %v1436_v53  ;;  %1938 = vrsqrt.f32 %v1410_v56  ;;  %v1396_v12 = vmul.f32 0.0078125, %v1374_v27  ;;  %v1395_v30 = vmul.f32 0.0078125, %v1372_v0 }
 0x498   :  { %v1929_v33 = vpop.eup %1928  ;;  %1940 = vrsqrt.f32 %v1409_v22 }
 0x499   :  { %v1931_v34 = vpop.eup %1930  ;;  %v1482_v20 = vadd.f32 %v2564_v26, %v1459_v7  ;;  %v1438_v52 = vmul.f32 %v1929_v33, %v2481_v45  ;;  %v1412_v36 = vadd.f32 1e-05, %v1396_v12  ;;  %v1411_v32 = vadd.f32 1e-05, %v1395_v30 }
 0x49a   :  { %v1435_v54 = vmul.f32 %v1931_v34, %v2484_v59  ;;  %v1378_v38 = vpop.xlane.xlu1 %1377  ;;  %v1376_v41 = vpop.xlane.xlu0 %1375 }
 0x49b   :  { %1498 = vst [vmem:[#allocation18 + $0x8] sm:$0xff] %v1482_v20  ;;  %v1461_v39 = vmul.f32 %v2558_v5, %v1438_v52  ;;  %1942 = vrsqrt.f32 %v1412_v36  ;;  %v1398_v44 = vmul.f32 0.0078125, %v1378_v38  ;;  %v1397_v42 = vmul.f32 0.0078125, %v1376_v41 }
 0x49c   :  { %v1933_v47 = vpop.eup %1932  ;;  %v1458_v23 = vmul.f32 %v2558_v5, %v1435_v54  ;;  %1944 = vrsqrt.f32 %v1411_v32 }
 0x49d   :  { %v1484_v31 = vadd.f32 %v2564_v26, %v1461_v39  ;;  %v1437_v45 = vmul.f32 %v1933_v47, %v2491_v2  ;;  %v1414_v51 = vadd.f32 1e-05, %v1398_v44  ;;  %v1413_v48 = vadd.f32 1e-05, %v1397_v42 }
 0x49e   :  { %v1481_v59 = vadd.f32 %v2564_v26, %v1458_v23  ;;  %v1382_v8 = vpop.xlane.xlu1 %1381  ;;  %v1380_v9 = vpop.xlane.xlu0 %1379 }
 0x49f   :  { %1500 = vst [vmem:[#allocation18 + $0x18] sm:$0xff] %v1484_v31  ;;  %v1460_v55 = vmul.f32 %v2558_v5, %v1437_v45  ;;  %1946 = vrsqrt.f32 %v1414_v51  ;;  %v1400_v57 = vmul.f32 0.0078125, %v1382_v8  ;;  %v1399_v58 = vmul.f32 0.0078125, %v1380_v9 }
 0x4a0   :  { %v1935_v60 = vpop.eup %1934  ;;  %1497 = vst [vmem:[#allocation18] sm:$0xff] %v1481_v59  ;;  %1948 = vrsqrt.f32 %v1413_v48 }
 0x4a1   :  { %v1937_v49 = vpop.eup %1936  ;;  %v1483_v18 = vadd.f32 %v2564_v26, %v1460_v55  ;;  %v1440_v2 = vmul.f32 %v1935_v60, %v2499_v14  ;;  %v1416_v61 = vadd.f32 1e-05, %v1400_v57  ;;  %v1415_v62 = vadd.f32 1e-05, %v1399_v58 }
 0x4a2   :  { %v1439_v1 = vmul.f32 %v1937_v49, %v2494_v19  ;;  %v1386_v3 = vpop.xlane.xlu1 %1385  ;;  %v1384_v24 = vpop.xlane.xlu0 %1383 }
 0x4a3   :  { %1499 = vst [vmem:[#allocation18 + $0x10] sm:$0xff] %v1483_v18  ;;  %v1463_v6 = vmul.f32 %v2558_v5, %v1440_v2  ;;  %1950 = vrsqrt.f32 %v1416_v61  ;;  %v1402_v10 = vmul.f32 0.0078125, %v1386_v3  ;;  %v1401_v11 = vmul.f32 0.0078125, %v1384_v24 }
 0x4a4   :  { %v1939_v15 = vpop.eup %1938  ;;  %v1462_v16 = vmul.f32 %v2558_v5, %v1439_v1  ;;  %1952 = vrsqrt.f32 %v1415_v62 }
 0x4a5   :  { %v1941_v63 = vpop.eup %1940  ;;  %v1486_v17 = vadd.f32 %v2564_v26, %v1463_v6  ;;  %v1442_v14 = vmul.f32 %v1939_v15, %v2509_v4  ;;  %v1418_v25 = vadd.f32 1e-05, %v1402_v10  ;;  %v1417_v21 = vadd.f32 1e-05, %v1401_v11 }
 0x4a6   :  { %v1485_v19 = vadd.f32 %v2564_v26, %v1462_v16  ;;  %v1441_v53 = vmul.f32 %v1941_v63, %v2502_v40 }
 0x4a7   :  { %1502 = vst [vmem:[#allocation18 + $0x28] sm:$0xff] %v1486_v17  ;;  %v1465_v56 = vmul.f32 %v2558_v5, %v1442_v14  ;;  %1954 = vrsqrt.f32 %v1418_v25 }
 0x4a8   :  { %v1943_v22 = vpop.eup %1942  ;;  %1501 = vst [vmem:[#allocation18 + $0x20] sm:$0xff] %v1485_v19  ;;  %v1464_v27 = vmul.f32 %v2558_v5, %v1441_v53  ;;  %1956 = vrsqrt.f32 %v1417_v21 }
 0x4a9   :  { %v1945_v0 = vpop.eup %1944  ;;  %v1488_v7 = vadd.f32 %v2564_v26, %v1465_v56  ;;  %v1444_v4 = vmul.f32 %v1943_v22, %v2519_v28 }
 0x4aa   :  { %v1487_v12 = vadd.f32 %v2564_v26, %v1464_v27  ;;  %v1443_v30 = vmul.f32 %v1945_v0, %v2512_v13 }
 0x4ab   :  { %1504 = vst [vmem:[#allocation18 + $0x38] sm:$0xff] %v1488_v7  ;;  %v1467_v40 = vmul.f32 %v2558_v5, %v1444_v4 }
 0x4ac   :  { %v1947_v33 = vpop.eup %1946  ;;  %1503 = vst [vmem:[#allocation18 + $0x30] sm:$0xff] %v1487_v12  ;;  %v1466_v34 = vmul.f32 %v2558_v5, %v1443_v30 }
 0x4ad   :  { %v1949_v20 = vpop.eup %1948  ;;  %v1490_v52 = vadd.f32 %v2564_v26, %v1467_v40  ;;  %v1446_v36 = vmul.f32 %v1947_v33, %v2529_v35 }
 0x4ae   :  { %v1489_v32 = vadd.f32 %v2564_v26, %v1466_v34  ;;  %v1445_v28 = vmul.f32 %v1949_v20, %v2522_v29 }
 0x4af   :  { %1506 = vst [vmem:[#allocation18 + $0x48] sm:$0xff] %v1490_v52  ;;  %v1469_v54 = vmul.f32 %v2558_v5, %v1446_v36 }
 0x4b0   :  { %v1951_v13 = vpop.eup %1950  ;;  %1505 = vst [vmem:[#allocation18 + $0x40] sm:$0xff] %v1489_v32  ;;  %v1468_v38 = vmul.f32 %v2558_v5, %v1445_v28 }
 0x4b1   :  { %v1953_v41 = vpop.eup %1952  ;;  %v1492_v39 = vadd.f32 %v2564_v26, %v1469_v54  ;;  %v1448_v44 = vmul.f32 %v1951_v13, %v2539_v43 }
 0x4b2   :  { %v1491_v42 = vadd.f32 %v2564_v26, %v1468_v38  ;;  %v1447_v35 = vmul.f32 %v1953_v41, %v2532_v37 }
 0x4b3   :  { %1508 = vst [vmem:[#allocation18 + $0x58] sm:$0xff] %v1492_v39  ;;  %v1471_v47 = vmul.f32 %v2558_v5, %v1448_v44 }
 0x4b4   :  { %v1955_v29 = vpop.eup %1954  ;;  %1507 = vst [vmem:[#allocation18 + $0x50] sm:$0xff] %v1491_v42  ;;  %v1470_v23 = vmul.f32 %v2558_v5, %v1447_v35 }
 0x4b5   :  { %v1957_v31 = vpop.eup %1956  ;;  %v1494_v45 = vadd.f32 %v2564_v26, %v1471_v47  ;;  %v1450_v51 = vmul.f32 %v1955_v29, %v2549_v50 }
 0x4b6   :  { %v1493_v48 = vadd.f32 %v2564_v26, %v1470_v23  ;;  %v1449_v43 = vmul.f32 %v1957_v31, %v2542_v46 }
 0x4b7   :  { %1510 = vst [vmem:[#allocation18 + $0x68] sm:$0xff] %v1494_v45  ;;  %v1473_v59 = vmul.f32 %v2558_v5, %v1450_v51 }
 0x4b8   :  { %1509 = vst [vmem:[#allocation18 + $0x60] sm:$0xff] %v1493_v48  ;;  %v1472_v37 = vmul.f32 %v2558_v5, %v1449_v43 }
 0x4b9   :  { %v1496_v8 = vadd.f32 %v2564_v26, %v1473_v59 }
 0x4ba   :  { %v1495_v9 = vadd.f32 %v2564_v26, %v1472_v37 }
 0x4bb   :  { %1512 = vst [vmem:[#allocation18 + $0x78] sm:$0xff] %v1496_v8 }
 0x4bc   :  { %1511 = vst [vmem:[#allocation18 + $0x70] sm:$0xff] %v1495_v9 }
 0x4bd   :  { %2097 = shalt.err (!%p2094_p7)
}
 0x4be   :  { %1524 = dma.vmem_to_hbm [thread:$0]  %s1519_s12, 2048, %s2632_s13, [#allocation9], %s2132_s24, %s2132_s24, %s2133_s25  }
 0x4bf   :  { %2120 = dma.done.wait [#allocation9], 2048  }
 0x4c0   :  { %2121 = vsyncadd [#allocation9], 4294965248 }
 0x4c1   :  { %1528 = vsyncpa [#allocation8], 1 }
 0x4c2   :  { %1529 = vsyncpa [#allocation11], 1 }
 0x4c3   :  { %1530 = vsyncpa [#allocation14], 1 }
 0x4c4   :  { %1531 = vsyncpa [#allocation17], 1 }
 0x4c5   :  { %1532 = vsyncpa [#allocation9], 1 }

</bundles_post_ra>
